<compile_context>
chip_gen: v6e
topology: v6e:2x2x1
jax: 0.10.0
libtpu: 0.0.40
codegen_flags: <defaults>
</compile_context>

<pallas_src>
import functools

import jax
import jax.numpy as jnp
from jax.experimental import pallas as pl
from jax.experimental.pallas import tpu as pltpu

# ----------------------------------------------------------------------------
# Generation-aware VMEM budgeting (v7x has 64 MiB, v5e/v6e have 128 MiB).
# ----------------------------------------------------------------------------
try:
    _VMEM_CAP = int(pltpu.get_tpu_info().vmem_capacity_bytes)
except Exception:  # fall back to the smallest (v7x) capacity if the query fails
    _VMEM_CAP = 64 * 1024 * 1024
_TILE_BUDGET = min(int(_VMEM_CAP * 0.6), 80 * 1024 * 1024)
_VMEM_LIMIT = min(int(_VMEM_CAP * 0.75), 100 * 1024 * 1024)

_TM_CAP = 4096          # M tile cap
_TN_CAP = 512           # lane-dense N tile cap (multiple of 256 for v6e/v7x MXU)
_TK_CAP = 2048          # reduction tile cap
_PALLAS_MIN_M = 128     # below this, plain XLA dot beats pallas_call overhead


def _round_up(x, m):
    return (x + m - 1) // m * m


def _apply_prologue(a, prologue):
    """Fused activation applied to A tiles (VPU work hides under the MXU)."""
    if prologue == "relu":
        return jnp.maximum(a, 0)
    if prologue == "leaky_relu":
        return jnp.where(a > 0, a, 0.2 * a)
    return a


# ----------------------------------------------------------------------------
# Pallas matmul: C[M,N] = act(A[M,K]) @ B[K,N]; bf16 operands, f32 accumulation.
# ----------------------------------------------------------------------------
def _make_single_step_kernel(prologue):
    # Single K step: no accumulator scratch, store (with cast) directly.
    def kernel(a_ref, b_ref, o_ref):
        a = _apply_prologue(a_ref[...], prologue)
        o_ref[...] = jnp.dot(
            a, b_ref[...], preferred_element_type=jnp.float32
        ).astype(o_ref.dtype)

    return kernel


def _make_multi_step_kernel(prologue):
    # K-tiled reduction: f32 VMEM accumulator, init/finalize via pl.when.
    def kernel(a_ref, b_ref, o_ref, acc_ref):
        @pl.when(pl.program_id(2) == 0)
        def _init():
            acc_ref[...] = jnp.zeros_like(acc_ref)

        a = _apply_prologue(a_ref[...], prologue)
        acc_ref[...] += jnp.dot(a, b_ref[...], preferred_element_type=jnp.float32)

        @pl.when(pl.program_id(2) == pl.num_programs(2) - 1)
        def _done():
            o_ref[...] = acc_ref[...].astype(o_ref.dtype)

    return kernel


def _choose_tiles(M, K, N, out_bytes):
    """Pick (TM, TK, TN) so the double-buffered footprint fits the VMEM budget."""
    Kr = _round_up(K, 128)

    # N tile: full-dim block when small (no B pad / output slice copies),
    # otherwise a lane-dense multiple of 128 that divides N when possible.
    if N <= _TN_CAP:
        TN = N
    else:
        TN = next((t for t in (512, 256, 128) if N % t == 0), _TN_CAP)

    # K (reduction) tile: a single step whenever it fits.
    if Kr <= _TK_CAP:
        TK = Kr
    else:
        TK = next((t for t in (2048, 1024, 512) if Kr % t == 0), _TK_CAP)

    # M tile: full dimension when it fits (no pad copy of A), else the cap.
    TM = M if M <= _TM_CAP else _TM_CAP

    def footprint(tm, tk, tn):
        f = 2 * (tm * tk * 2) + 2 * (tk * tn * 2) + 2 * (tm * tn * out_bytes)
        if Kr > tk:                      # multi-K kernel carries an f32 scratch
            f += tm * tn * 4
        return f

    while TM > 256 and footprint(TM, TK, TN) > _TILE_BUDGET:
        TM = max(256, _round_up(TM // 2, 16))
    while TK > 512 and footprint(TM, TK, TN) > _TILE_BUDGET:
        TK = max(512, _round_up(TK // 2, 128))

    # v7x megacore: keep a 'parallel' axis with >= 2 blocks for mid-sized
    # layers, but only when the split introduces no M padding.
    if (M >= 512 and M % 32 == 0
            and _round_up(M, TM) // TM == 1 and _round_up(N, TN) // TN == 1):
        TM = M // 2

    return TM, TK, TN


def pallas_matmul(a, b, prologue=None, out_dtype=jnp.float32):
    """a: (M, K) bf16, b: (K, N) bf16 -> (M, N) out_dtype (f32 MXU accumulation).

    `prologue` in {None, "relu", "leaky_relu"} is applied to A tiles in-kernel,
    fusing the preceding activation and saving a full HBM pass over A.
    """
    M, K = a.shape
    K2, N = b.shape
    assert K == K2

    if M < _PALLAS_MIN_M:
        # Deep 1x1 / 2x2-spatial layers: dominated by pallas_call fixed
        # overhead and (8,128) padding -> let XLA handle them directly.
        out = jnp.dot(_apply_prologue(a, prologue), b,
                      preferred_element_type=jnp.float32)
        return out.astype(out_dtype)

    out_bytes = jnp.dtype(out_dtype).itemsize
    TM, TK, TN = _choose_tiles(M, K, N, out_bytes)
    Mp, Kp, Np = _round_up(M, TM), _round_up(K, TK), _round_up(N, TN)

    if (Mp, Kp) != (M, K):
        a = jnp.pad(a, ((0, Mp - M), (0, Kp - K)))
    if (Kp, Np) != (K, N):
        b = jnp.pad(b, ((0, Kp - K), (0, Np - N)))

    n_k = Kp // TK
    if n_k == 1:
        kernel = _make_single_step_kernel(prologue)
        scratch = []
    else:
        kernel = _make_multi_step_kernel(prologue)
        scratch = [pltpu.VMEM((TM, TN), jnp.float32)]

    out = pl.pallas_call(
        kernel,
        out_shape=jax.ShapeDtypeStruct((Mp, Np), out_dtype),
        grid=(Mp // TM, Np // TN, n_k),
        in_specs=[
            pl.BlockSpec((TM, TK), lambda i, j, k: (i, k)),
            pl.BlockSpec((TK, TN), lambda i, j, k: (k, j)),
        ],
        out_specs=pl.BlockSpec((TM, TN), lambda i, j, k: (i, j)),
        scratch_shapes=scratch,
        compiler_params=pltpu.CompilerParams(
            dimension_semantics=("parallel", "parallel", "arbitrary"),
            vmem_limit_bytes=_VMEM_LIMIT,
        ),
    )(a, b)

    if (Mp, Np) != (M, N):
        out = out[:M, :N]
    return out


# ----------------------------------------------------------------------------
# Conv2d(k=4, s=2, p=1, bias=False) via bf16 im2col + Pallas matmul.
#   x: NHWC f32, w: (Co, Ci, 4, 4) -> NHWC f32
#   leaky=True fuses the preceding LeakyReLU(0.2) into the matmul prologue.
# ----------------------------------------------------------------------------
def conv_down(x, w, leaky=False):
    N, H, W, C = x.shape
    Co = w.shape[0]
    Ho, Wo = H // 2, W // 2

    # Channel pad to a multiple of 8 so K = 16*Cp is a multiple of 128 and the
    # large im2col matrix is never re-copied by jnp.pad inside pallas_matmul.
    Cp = _round_up(C, 8)
    xb = x.astype(jnp.bfloat16)
    # One fused pad: +1 spatial ring for the conv + channel pad.
    xp = jnp.pad(xb, ((0, 0), (1, 1), (1, 1), (0, Cp - C)))
    if Cp != C:
        w = jnp.pad(w, ((0, 0), (0, Cp - C), (0, 0), (0, 0)))

    patches = [
        xp[:, kh:kh + 2 * Ho:2, kw:kw + 2 * Wo:2, :]
        for kh in range(4) for kw in range(4)
    ]
    a = jnp.stack(patches, axis=3).reshape(N * Ho * Wo, 16 * Cp)     # bf16
    w_mat = jnp.transpose(w, (2, 3, 1, 0)).reshape(16 * Cp, Co)      # (kh,kw,ci)->co
    w_mat = w_mat.astype(jnp.bfloat16)

    out = pallas_matmul(a, w_mat,
                        prologue=("leaky_relu" if leaky else None),
                        out_dtype=jnp.float32)
    return out.reshape(N, Ho, Wo, Co)


# ----------------------------------------------------------------------------
# ConvTranspose2d(k=4, s=2, p=1) via sub-pixel decomposition:
#   matmul x(M, C) @ W(C, 16*Co) -> per-pixel 4x4 patches (bf16), then a 4-tap
#   parity shift-add (f32) and parity interleave.  The input is pre-padded so
#   the patch tensor comes out already padded (no full-size jnp.pad of it).
#   x: NHWC f32, w: (Ci, Co, 4, 4) -> NHWC f32
#   fuse_relu=True fuses the preceding ReLU into the matmul prologue.
# ----------------------------------------------------------------------------
def conv_up(x, w, bias=None, fuse_relu=False):
    N, H, W, C = x.shape
    Co = w.shape[1]
    Cr = _round_up(C, 128)

    xb = x.astype(jnp.bfloat16)
    # One fused pad: +1 spatial ring (pre-pads the patch tensor) + channel pad
    # to a multiple of 128 (pallas_matmul never re-copies the big A matrix).
    xp = jnp.pad(xb, ((0, 0), (1, 1), (1, 1), (0, Cr - C)))
    a = xp.reshape(N * (H + 2) * (W + 2), Cr)

    wp = w if Cr == C else jnp.pad(w, ((0, Cr - C), (0, 0), (0, 0), (0, 0)))
    w2 = jnp.transpose(wp, (0, 2, 3, 1)).reshape(Cr, 16 * Co).astype(jnp.bfloat16)

    # bf16 patch output halves the HBM traffic of the largest intermediate.
    y = pallas_matmul(a, w2,
                      prologue=("relu" if fuse_relu else None),
                      out_dtype=jnp.bfloat16)           # (N*(H+2)*(W+2), 16*Co)
    patch_p = y.reshape(N, H + 2, W + 2, 4, 4, Co)

    # out[n, 2a+r, 2b+s] = sum over the 2x2 (kh,kw) taps valid for parity (r,s)
    #   r=0: (kh=1, dh=0), (kh=3, dh=-1);   r=1: (kh=2, dh=0), (kh=0, dh=+1)
    terms = {0: ((1, 0), (3, -1)), 1: ((2, 0), (0, 1))}

    quads = []
    for r in (0, 1):
        row = []
        for s in (0, 1):
            acc = jnp.zeros((N, H, W, Co), jnp.float32)
            for kh, dh in terms[r]:
                for kw, dw in terms[s]:
                    acc = acc + patch_p[:, 1 + dh:1 + dh + H,
                                        1 + dw:1 + dw + W, kh, kw, :
                                        ].astype(jnp.float32)
            row.append(acc)
        quads.append(row)

    top = jnp.stack([quads[0][0], quads[0][1]], axis=3)     # (N,H,W,2,Co) r=0
    bot = jnp.stack([quads[1][0], quads[1][1]], axis=3)     # (N,H,W,2,Co) r=1
    out = jnp.stack([top, bot], axis=2)                     # (N,H,2,W,2,Co)
    out = out.reshape(N, 2 * H, 2 * W, Co)

    if bias is not None:
        out = out + bias
    return out


# ----------------------------------------------------------------------------
# BatchNorm2d (training mode: batch statistics, eps=1e-5, affine), f32.
# ----------------------------------------------------------------------------
def batchnorm(x, gamma, beta, eps=1e-5):
    mean = jnp.mean(x, axis=(0, 1, 2), keepdims=True)
    var = jnp.mean(jnp.square(x - mean), axis=(0, 1, 2), keepdims=True)
    return gamma * (x - mean) / jnp.sqrt(var + eps) + beta


# ----------------------------------------------------------------------------
# U-Net structure (matches UnetGenerator.__init__)
# ----------------------------------------------------------------------------
def build_block_configs(input_nc, output_nc, num_downs, ngf):
    assert input_nc == output_nc
    cfgs = [dict(outer=output_nc, inner=ngf, kind="outermost"),
            dict(outer=ngf, inner=ngf * 2, kind="middle"),
            dict(outer=ngf * 2, inner=ngf * 4, kind="middle"),
            dict(outer=ngf * 4, inner=ngf * 8, kind="middle")]
    for _ in range(num_downs - 5):
        cfgs.append(dict(outer=ngf * 8, inner=ngf * 8, kind="middle"))
    cfgs.append(dict(outer=ngf * 8, inner=ngf * 8, kind="innermost"))
    return cfgs


def init_params(key, cfgs):
    params = []
    for cfg in cfgs:
        outer, inner, kind = cfg["outer"], cfg["inner"], cfg["kind"]
        key, k1, k2 = jax.random.split(key, 3)
        p = {}
        # down conv: Conv2d(outer -> inner, k=4, s=2, p=1, bias=False)
        p["dw"] = 0.02 * jax.random.normal(k1, (inner, outer, 4, 4), jnp.float32)
        up_in = inner if kind == "innermost" else inner * 2
        # up conv: ConvTranspose2d(up_in -> outer, k=4, s=2, p=1)
        p["uw"] = 0.02 * jax.random.normal(k2, (up_in, outer, 4, 4), jnp.float32)
        if kind == "outermost":
            p["ub"] = jnp.zeros((outer,), jnp.float32)   # only outermost has bias
        else:
            p["u_gamma"] = jnp.ones((outer,), jnp.float32)
            p["u_beta"] = jnp.zeros((outer,), jnp.float32)
        if kind == "middle":
            p["d_gamma"] = jnp.ones((inner,), jnp.float32)
            p["d_beta"] = jnp.zeros((inner,), jnp.float32)
        params.append(p)
    return params


def block_forward(params, cfgs, idx, x):
    cfg, p = cfgs[idx], params[idx]
    kind = cfg["kind"]
    if kind == "outermost":
        d = conv_down(x, p["dw"])                              # no pre-activation
        m = block_forward(params, cfgs, idx + 1, d)
        u = conv_up(m, p["uw"], bias=p["ub"], fuse_relu=True)  # uRelu fused
        return jnp.tanh(u)
    elif kind == "innermost":
        d = conv_down(x, p["dw"], leaky=True)                  # dRelu fused
        u = conv_up(d, p["uw"], fuse_relu=True)                # uRelu fused
        u = batchnorm(u, p["u_gamma"], p["u_beta"])
        return jnp.concatenate([u, x], axis=-1)
    else:  # middle
        d = conv_down(x, p["dw"], leaky=True)                  # dRelu fused
        d = batchnorm(d, p["d_gamma"], p["d_beta"])
        m = block_forward(params, cfgs, idx + 1, d)
        u = conv_up(m, p["uw"], fuse_relu=True)                # uRelu fused
        u = batchnorm(u, p["u_gamma"], p["u_beta"])
        return jnp.concatenate([u, x], axis=-1)
        # TODO(synk): use_dropout=True path (nn.Dropout(0.5)) not implemented.


def unet_generator_forward(params, cfgs, x_nchw, learn_residual=False):
    # layout: convert NCHW (PyTorch) -> NHWC for the kernels, back at the end.
    x = jnp.transpose(x_nchw, (0, 2, 3, 1)).astype(jnp.float32)
    out = block_forward(params, cfgs, 0, x)
    out_nchw = jnp.transpose(out, (0, 3, 1, 2))
    if learn_residual:
        out_nchw = jnp.clip(x_nchw + out_nchw, -1.0, 1.0)
    return out_nchw


if __name__ == "__main__":
    # Small, U-Net-consistent shapes: num_downs=5 requires spatial >= 2^5 = 32.
    input_nc = output_nc = 3
    num_downs = 5
    ngf = 8
    batch, H, W = 2, 32, 32

    key = jax.random.PRNGKey(0)
    key, kx, kp = jax.random.split(key, 3)
    x = jax.random.normal(kx, (batch, input_nc, H, W), jnp.float32)

    cfgs = build_block_configs(input_nc, output_nc, num_downs, ngf)
    params = init_params(kp, cfgs)

    fwd = jax.jit(functools.partial(unet_generator_forward, params, cfgs))
    out = fwd(x)
    jax.block_until_ready(out)
    assert out.shape == (batch, output_nc, H, W), out.shape
    assert bool(jnp.all(jnp.isfinite(out))), "non-finite output"
    print("KERNEL_OK")
</pallas_src>

<mosaic_0001>
module attributes {stable_mosaic.version = 11 : i64} {
  func.func @kernel(%arg0: i32, %arg1: i32, %arg2: i32, %arg3: memref<256x128xbf16, #tpu.memory_space<vmem>>, %arg4: memref<128x8xbf16, #tpu.memory_space<vmem>>, %arg5: memref<256x8xf32, #tpu.memory_space<vmem>>) attributes {dimension_semantics = [#tpu.dimension_semantics<parallel>, #tpu.dimension_semantics<parallel>, #tpu.dimension_semantics<arbitrary>], iteration_bounds = array<i64: 2, 1, 1>, scalar_prefetch = 0 : i64, scratch_operands = 0 : i64, tpu.core_type = #tpu.core_type<tc>, window_params = [{transform_indices = @transform_0, window_bounds = array<i64: 256, 128>}, {transform_indices = @transform_1, window_bounds = array<i64: 128, 8>}, {transform_indices = @transform_2, window_bounds = array<i64: 256, 8>}]} {
    %c0 = arith.constant 0 : index
    %c0_0 = arith.constant 0 : index
    %0 = vector.load %arg3[%c0, %c0_0] : memref<256x128xbf16, #tpu.memory_space<vmem>>, vector<256x128xbf16>
    %c0_1 = arith.constant 0 : index
    %c0_2 = arith.constant 0 : index
    %1 = vector.load %arg4[%c0_1, %c0_2] : memref<128x8xbf16, #tpu.memory_space<vmem>>, vector<128x8xbf16>
    %cst = arith.constant dense<0.000000e+00> : vector<256x8xf32>
    %2 = tpu.matmul %0, %1, %cst {dimension_numbers = #tpu.dot_dimension_numbers<[1], [0], [0], [1], [0, 0, 1, 1], [], []>} : vector<256x128xbf16>, vector<128x8xbf16>, vector<256x8xf32> -> vector<256x8xf32>
    %c0_3 = arith.constant 0 : index
    %c0_4 = arith.constant 0 : index
    %3 = vector.load %arg5[%c0_3, %c0_4] : memref<256x8xf32, #tpu.memory_space<vmem>>, vector<256x8xf32>
    tpu.vector_store %arg5[%c0_3, %c0_4], %2 {strides = array<i32>} : memref<256x8xf32, #tpu.memory_space<vmem>>, vector<256x8xf32>,
    return
  }
  func.func @transform_0(%arg0: i32, %arg1: i32, %arg2: i32) -> (i32, i32) {
    %c0_i32 = arith.constant 0 : i32
    return %arg0, %arg2 : i32, i32
  }
  func.func @transform_1(%arg0: i32, %arg1: i32, %arg2: i32) -> (i32, i32) {
    %c0_i32 = arith.constant 0 : i32
    return %arg2, %arg1 : i32, i32
  }
  func.func @transform_2(%arg0: i32, %arg1: i32, %arg2: i32) -> (i32, i32) {
    %c0_i32 = arith.constant 0 : i32
    return %arg0, %arg1 : i32, i32
  }
}

module attributes {stable_mosaic.version = 11 : i64} {
  func.func @kernel(%arg0: i32, %arg1: i32, %arg2: i32, %arg3: memref<128x128xbf16, #tpu.memory_space<vmem>>, %arg4: memref<128x16xbf16, #tpu.memory_space<vmem>>, %arg5: memref<128x16xf32, #tpu.memory_space<vmem>>) attributes {dimension_semantics = [#tpu.dimension_semantics<parallel>, #tpu.dimension_semantics<parallel>, #tpu.dimension_semantics<arbitrary>], iteration_bounds = array<i64: 1, 1, 1>, scalar_prefetch = 0 : i64, scratch_operands = 0 : i64, tpu.core_type = #tpu.core_type<tc>, window_params = [{transform_indices = @transform_0, window_bounds = array<i64: 128, 128>}, {transform_indices = @transform_1, window_bounds = array<i64: 128, 16>}, {transform_indices = @transform_2, window_bounds = array<i64: 128, 16>}]} {
    %c0 = arith.constant 0 : index
    %c0_0 = arith.constant 0 : index
    %0 = vector.load %arg3[%c0, %c0_0] : memref<128x128xbf16, #tpu.memory_space<vmem>>, vector<128x128xbf16>
    %cst = arith.constant 0.000000e+00 : bf16
    %1 = vector.broadcast %cst : bf16 to vector<128x128xbf16>
    %2 = arith.cmpf ogt, %0, %1 : vector<128x128xbf16>
    %cst_1 = arith.constant 2.001950e-01 : bf16
    %3 = vector.broadcast %cst_1 : bf16 to vector<128x128xbf16>
    %4 = arith.mulf %3, %0 : vector<128x128xbf16>
    %5 = arith.select %2, %0, %4 : vector<128x128xi1>, vector<128x128xbf16>
    %c0_2 = arith.constant 0 : index
    %c0_3 = arith.constant 0 : index
    %6 = vector.load %arg4[%c0_2, %c0_3] : memref<128x16xbf16, #tpu.memory_space<vmem>>, vector<128x16xbf16>
    %cst_4 = arith.constant dense<0.000000e+00> : vector<128x16xf32>
    %7 = tpu.matmul %5, %6, %cst_4 {dimension_numbers = #tpu.dot_dimension_numbers<[1], [0], [0], [1], [0, 0, 1, 1], [], []>} : vector<128x128xbf16>, vector<128x16xbf16>, vector<128x16xf32> -> vector<128x16xf32>
    %c0_5 = arith.constant 0 : index
    %c0_6 = arith.constant 0 : index
    %8 = vector.load %arg5[%c0_5, %c0_6] : memref<128x16xf32, #tpu.memory_space<vmem>>, vector<128x16xf32>
    tpu.vector_store %arg5[%c0_5, %c0_6], %7 {strides = array<i32>} : memref<128x16xf32, #tpu.memory_space<vmem>>, vector<128x16xf32>,
    return
  }
  func.func @transform_0(%arg0: i32, %arg1: i32, %arg2: i32) -> (i32, i32) {
    %c0_i32 = arith.constant 0 : i32
    return %arg0, %arg2 : i32, i32
  }
  func.func @transform_1(%arg0: i32, %arg1: i32, %arg2: i32) -> (i32, i32) {
    %c0_i32 = arith.constant 0 : i32
    return %arg2, %arg1 : i32, i32
  }
  func.func @transform_2(%arg0: i32, %arg1: i32, %arg2: i32) -> (i32, i32) {
    %c0_i32 = arith.constant 0 : i32
    return %arg0, %arg1 : i32, i32
  }
}

module attributes {stable_mosaic.version = 11 : i64} {
  func.func @kernel(%arg0: i32, %arg1: i32, %arg2: i32, %arg3: memref<200x128xbf16, #tpu.memory_space<vmem>>, %arg4: memref<128x128xbf16, #tpu.memory_space<vmem>>, %arg5: memref<200x128xbf16, #tpu.memory_space<vmem>>) attributes {dimension_semantics = [#tpu.dimension_semantics<parallel>, #tpu.dimension_semantics<parallel>, #tpu.dimension_semantics<arbitrary>], iteration_bounds = array<i64: 1, 1, 1>, scalar_prefetch = 0 : i64, scratch_operands = 0 : i64, tpu.core_type = #tpu.core_type<tc>, window_params = [{transform_indices = @transform_0, window_bounds = array<i64: 200, 128>}, {transform_indices = @transform_1, window_bounds = array<i64: 128, 128>}, {transform_indices = @transform_2, window_bounds = array<i64: 200, 128>}]} {
    %c0 = arith.constant 0 : index
    %c0_0 = arith.constant 0 : index
    %0 = vector.load %arg3[%c0, %c0_0] : memref<200x128xbf16, #tpu.memory_space<vmem>>, vector<200x128xbf16>
    %cst = arith.constant 0.000000e+00 : bf16
    %1 = vector.broadcast %cst : bf16 to vector<200x128xbf16>
    %2 = arith.maximumf %0, %1 : vector<200x128xbf16>
    %c0_1 = arith.constant 0 : index
    %c0_2 = arith.constant 0 : index
    %3 = vector.load %arg4[%c0_1, %c0_2] : memref<128x128xbf16, #tpu.memory_space<vmem>>, vector<128x128xbf16>
    %cst_3 = arith.constant dense<0.000000e+00> : vector<200x128xf32>
    %4 = tpu.matmul %2, %3, %cst_3 {dimension_numbers = #tpu.dot_dimension_numbers<[1], [0], [0], [1], [0, 0, 1, 1], [], []>} : vector<200x128xbf16>, vector<128x128xbf16>, vector<200x128xf32> -> vector<200x128xf32>
    %5 = arith.truncf %4 : vector<200x128xf32> to vector<200x128xbf16>
    %c0_4 = arith.constant 0 : index
    %c0_5 = arith.constant 0 : index
    %6 = vector.load %arg5[%c0_4, %c0_5] : memref<200x128xbf16, #tpu.memory_space<vmem>>, vector<200x128xbf16>
    tpu.vector_store %arg5[%c0_4, %c0_5], %5 {strides = array<i32>} : memref<200x128xbf16, #tpu.memory_space<vmem>>, vector<200x128xbf16>,
    return
  }
  func.func @transform_0(%arg0: i32, %arg1: i32, %arg2: i32) -> (i32, i32) {
    %c0_i32 = arith.constant 0 : i32
    return %arg0, %arg2 : i32, i32
  }
  func.func @transform_1(%arg0: i32, %arg1: i32, %arg2: i32) -> (i32, i32) {
    %c0_i32 = arith.constant 0 : i32
    return %arg2, %arg1 : i32, i32
  }
  func.func @transform_2(%arg0: i32, %arg1: i32, %arg2: i32) -> (i32, i32) {
    %c0_i32 = arith.constant 0 : i32
    return %arg0, %arg1 : i32, i32
  }
}

module attributes {stable_mosaic.version = 11 : i64} {
  func.func @kernel(%arg0: i32, %arg1: i32, %arg2: i32, %arg3: memref<648x128xbf16, #tpu.memory_space<vmem>>, %arg4: memref<128x48xbf16, #tpu.memory_space<vmem>>, %arg5: memref<648x48xbf16, #tpu.memory_space<vmem>>) attributes {dimension_semantics = [#tpu.dimension_semantics<parallel>, #tpu.dimension_semantics<parallel>, #tpu.dimension_semantics<arbitrary>], iteration_bounds = array<i64: 1, 1, 1>, scalar_prefetch = 0 : i64, scratch_operands = 0 : i64, tpu.core_type = #tpu.core_type<tc>, window_params = [{transform_indices = @transform_0, window_bounds = array<i64: 648, 128>}, {transform_indices = @transform_1, window_bounds = array<i64: 128, 48>}, {transform_indices = @transform_2, window_bounds = array<i64: 648, 48>}]} {
    %c0 = arith.constant 0 : index
    %c0_0 = arith.constant 0 : index
    %0 = vector.load %arg3[%c0, %c0_0] : memref<648x128xbf16, #tpu.memory_space<vmem>>, vector<648x128xbf16>
    %cst = arith.constant 0.000000e+00 : bf16
    %1 = vector.broadcast %cst : bf16 to vector<648x128xbf16>
    %2 = arith.maximumf %0, %1 : vector<648x128xbf16>
    %c0_1 = arith.constant 0 : index
    %c0_2 = arith.constant 0 : index
    %3 = vector.load %arg4[%c0_1, %c0_2] : memref<128x48xbf16, #tpu.memory_space<vmem>>, vector<128x48xbf16>
    %cst_3 = arith.constant dense<0.000000e+00> : vector<648x48xf32>
    %4 = tpu.matmul %2, %3, %cst_3 {dimension_numbers = #tpu.dot_dimension_numbers<[1], [0], [0], [1], [0, 0, 1, 1], [], []>} : vector<648x128xbf16>, vector<128x48xbf16>, vector<648x48xf32> -> vector<648x48xf32>
    %5 = arith.truncf %4 : vector<648x48xf32> to vector<648x48xbf16>
    %c0_4 = arith.constant 0 : index
    %c0_5 = arith.constant 0 : index
    %6 = vector.load %arg5[%c0_4, %c0_5] : memref<648x48xbf16, #tpu.memory_space<vmem>>, vector<648x48xbf16>
    tpu.vector_store %arg5[%c0_4, %c0_5], %5 {strides = array<i32>} : memref<648x48xbf16, #tpu.memory_space<vmem>>, vector<648x48xbf16>,
    return
  }
  func.func @transform_0(%arg0: i32, %arg1: i32, %arg2: i32) -> (i32, i32) {
    %c0_i32 = arith.constant 0 : i32
    return %arg0, %arg2 : i32, i32
  }
  func.func @transform_1(%arg0: i32, %arg1: i32, %arg2: i32) -> (i32, i32) {
    %c0_i32 = arith.constant 0 : i32
    return %arg2, %arg1 : i32, i32
  }
  func.func @transform_2(%arg0: i32, %arg1: i32, %arg2: i32) -> (i32, i32) {
    %c0_i32 = arith.constant 0 : i32
    return %arg0, %arg1 : i32, i32
  }
}

</mosaic_0001>

<bundles_post_ra>
// kernel: unet_generator_forward.4
= control target key start
LH: loop header
LB: loop body
LE: loop exit
PB: predicated region body
PF: predicated region fallthrough
CT: control target
= control target key end

     0   :  { %s915_s9 = smov 0   ;;  %s917_s10 = smov 0   ;;  %s1060_s0 = inlined_call_operand.vmem [shape: bf16[512,128], index: 0, kind: input, shape index: {}]   ;;  %s1061_s1 = inlined_call_operand.vmem [shape: bf16[128,8], index: 1, kind: input, shape index: {}]   ;;  %s1062_s2 = inlined_call_operand.vmem [shape: f32[512,8], index: 2, kind: output, shape index: {}]  }
   0x1   :  { %s919_s11 = smov 0  }
   0x2 LB: > { %s31_s12 = sadd.s32 1, %s894_s10  ;;  %p709_p0 = scmp.ge.s32.totalorder %s898_s11, 1  ;;  %s898_s11 = sphi %s919_s11, %s12_s11   ;;  %s894_s10 = sphi %s917_s10, %s1064_s10   ;;  %s890_s9 = sphi %s915_s9, %s1063_s9  }
   0x3   : > { %p33_p1 = scmp.ge.s32.totalorder %s31_s12, 2  ;;  %p155_p2 = scmp.lt.s32.totalorder %s898_s11, 3 }
   0x5   : > { %s1066_s12 = smov (%p33_p1, %s31_s12), 0  ;;  %p156_p3 = pnand %p709_p0, %p155_p2 }
   0x6   : > { %s710_s15 = sshll.u32 (!%p156_p3), %s890_s9, 5 }
   0x7   : > { %159 = sbr.rel (%p156_p3) target bundleno = 269 (0x10d), region = 28  ;;  %p192_p4 = scmp.lt.s32.totalorder (!%p156_p3), %s710_s15, 63 }
   0xc   : > { %v852_v0 = vld [vmem:[%s1061_s1 + $0x38] sm:$0xff]   ;;  %v853_v1 = vld [vmem:[%s1061_s1 + $0x30] sm:$0xff]   ;;  %s1068_s15 = smov (!%p192_p4, %s710_s15), 63  ;;  %v854_v2 = vld [vmem:[%s1061_s1 + $0x28] sm:$0xff]   ;;  %vm572_vm0 = vcmask 64512  }
   0xd   : > { %764 = vmatprep.subr.bf16.mxu0 %v852_v0  ;;  %812 = vmatprep.subr.bf16.mxu1 %v852_v0  ;;  %s711_s20 = sshll.u32 %s1068_s15, 2  ;;  %v855_v3 = vld [vmem:[%s1061_s1 + $0x20] sm:$0xff]   ;;  %v856_v6 = vld [vmem:[%s1061_s1 + $0x18] sm:$0xff]   ;;  %v857_v7 = vld [vmem:[%s1061_s1 + $0x10] sm:$0xff]   ;;  %s713_s6 = sshll.u32 %s1068_s15, 3 }
   0xe   : > { %765 = vmatpush3.bf16.msra.mxu0 %v852_v0  ;;  %820 = vmatpush3.bf16.msra.mxu1 %v852_v0  ;;  %s948_s23 = scalar_lea.vmem %s1060_s0, %s711_s20  ;;  %v858_v8 = vld [vmem:[%s1061_s1 + $0x8] sm:$0xff]   ;;  %v859_v9 = vld [vmem:[%s1061_s1] sm:$0xff]   ;;  %s985_s9 = scalar_lea.vmem %s1062_s2, %s713_s6 }
   0xf   : > { %766 = vmatprep.subr.bf16.mxu0 %v853_v1  ;;  %813 = vmatprep.subr.bf16.mxu1 %v853_v1  ;;  %v860_v4 = vld [vmem:[%s948_s23] sm:$0xff]   ;;  %v862_v10 = vld [vmem:[%s948_s23 + $0x8] sm:$0xff]   ;;  %v864_v12 = vld [vmem:[%s948_s23 + $0x10] sm:$0xff]  }
  0x10   : > { %v861_v5 = vld [vmem:[%s948_s23 + $0x40] sm:$0xff]   ;;  %780 = vmatprep.mubr.bf16.mxu0 %v860_v4  ;;  %v863_v11 = vld [vmem:[%s948_s23 + $0x48] sm:$0xff]   ;;  %v865_v13 = vld [vmem:[%s948_s23 + $0x50] sm:$0xff]  }
  0x11   : > { %796 = vmatprep.mubr.bf16.mxu1 %v861_v5  ;;  %v866_v14 = vld [vmem:[%s948_s23 + $0x18] sm:$0xff]   ;;  %v868_v16 = vld [vmem:[%s948_s23 + $0x20] sm:$0xff]   ;;  %v870_v18 = vld [vmem:[%s948_s23 + $0x28] sm:$0xff]  }
  0x12   : > { %767 = vmatpush3.bf16.msra.mxu0 %v853_v1  ;;  %821 = vmatpush3.bf16.msra.mxu1 %v853_v1  ;;  %v867_v15 = vld [vmem:[%s948_s23 + $0x58] sm:$0xff]   ;;  %v869_v17 = vld [vmem:[%s948_s23 + $0x60] sm:$0xff]   ;;  %v871_v19 = vld [vmem:[%s948_s23 + $0x68] sm:$0xff]  }
  0x13   : > { %768 = vmatprep.subr.bf16.mxu0 %v854_v2  ;;  %814 = vmatprep.subr.bf16.mxu1 %v854_v2  ;;  %v872_v20 = vld [vmem:[%s948_s23 + $0x30] sm:$0xff]   ;;  %v874_v22 = vld [vmem:[%s948_s23 + $0x38] sm:$0xff]  }
  0x14   : > { %v873_v21 = vld [vmem:[%s948_s23 + $0x70] sm:$0xff]   ;;  %v875_v23 = vld [vmem:[%s948_s23 + $0x78] sm:$0xff]  }
  0x16   : > { %769 = vmatpush3.bf16.msra.mxu0 %v854_v2  ;;  %822 = vmatpush3.bf16.msra.mxu1 %v854_v2 }
  0x17   : > { %770 = vmatprep.subr.bf16.mxu0 %v855_v3  ;;  %815 = vmatprep.subr.bf16.mxu1 %v855_v3 }
  0x1a   : > { %771 = vmatpush3.bf16.msra.mxu0 %v855_v3  ;;  %823 = vmatpush3.bf16.msra.mxu1 %v855_v3 }
  0x1b   : > { %772 = vmatprep.subr.bf16.mxu0 %v856_v6  ;;  %816 = vmatprep.subr.bf16.mxu1 %v856_v6 }
  0x1e   : > { %773 = vmatpush3.bf16.msra.mxu0 %v856_v6  ;;  %824 = vmatpush3.bf16.msra.mxu1 %v856_v6 }
  0x1f   : > { %774 = vmatprep.subr.bf16.mxu0 %v857_v7  ;;  %817 = vmatprep.subr.bf16.mxu1 %v857_v7 }
  0x22   : > { %775 = vmatpush3.bf16.msra.mxu0 %v857_v7  ;;  %825 = vmatpush3.bf16.msra.mxu1 %v857_v7 }
  0x23   : > { %776 = vmatprep.subr.bf16.mxu0 %v858_v8  ;;  %818 = vmatprep.subr.bf16.mxu1 %v858_v8 }
  0x26   : > { %777 = vmatpush3.bf16.msra.mxu0 %v858_v8  ;;  %826 = vmatpush3.bf16.msra.mxu1 %v858_v8 }
  0x27   : > { %778 = vmatprep.subr.bf16.mxu0 %v859_v9  ;;  %819 = vmatprep.subr.bf16.mxu1 %v859_v9 }
  0x2a   : > { %779 = vmatpush3.bf16.msra.mxu0 %v859_v9  ;;  %827 = vmatpush3.bf16.msra.mxu1 %v859_v9 }
  0x2d   : > { %781 = vmatmul.mubr.bf16.vlgmr.msra.gmra.mxu0 %v862_v10  ;;  %797 = vmatmul.mubr.bf16.vlgmr.msra.gmra.mxu1 %v863_v11 }
  0x2e   : > { %784 = vmatprep.mubr.bf16.mxu0 %v864_v12  ;;  %800 = vmatprep.mubr.bf16.mxu1 %v865_v13 }
  0x35   : > { %785 = vmatmul.mubr.bf16.gmra.mxu0 %v866_v14  ;;  %801 = vmatmul.mubr.bf16.gmra.mxu1 %v867_v15 }
  0x36   : > { %788 = vmatprep.mubr.bf16.mxu0 %v868_v16  ;;  %804 = vmatprep.mubr.bf16.mxu1 %v869_v17 }
  0x3d   : > { %789 = vmatmul.mubr.bf16.gmra.mxu0 %v870_v18  ;;  %805 = vmatmul.mubr.bf16.gmra.mxu1 %v871_v19 }
  0x3e   : > { %792 = vmatprep.mubr.bf16.mxu0 %v872_v20  ;;  %808 = vmatprep.mubr.bf16.mxu1 %v873_v21 }
  0x45   : > { %793 = vmatmul.mubr.bf16.gmra.mxu0 %v874_v22  ;;  %809 = vmatmul.mubr.bf16.gmra.mxu1 %v875_v23 }
  0xed   : > { %v782_v24 = vpop.f32.mrf.mxu0  ;;  %v798_v25 = vpop.f32.mrf.mxu1 }
  0xee   : > { %575 = vst.msk [vmem:[%s985_s9 + $0x10] sm:$0xff] %vm572_vm0, %v782_v24  ;;  %591 = vst.msk [vmem:[%s985_s9 + $0x90] sm:$0xff] %vm572_vm0, %v798_v25 }
  0xef   : > { %v445_v26 = vpop.f32.mrf.mxu0  ;;  %v509_v27 = vpop.f32.mrf.mxu1 }
  0xf0   : > { %573 = vst.msk [vmem:[%s985_s9] sm:$0xff] %vm572_vm0, %v445_v26  ;;  %589 = vst.msk [vmem:[%s985_s9 + $0x80] sm:$0xff] %vm572_vm0, %v509_v27 }
  0xf1   : > { %v783_v28 = vpop.f32.mrf.mxu0  ;;  %v799_v29 = vpop.f32.mrf.mxu1 }
  0xf2   : > { %576 = vst.msk [vmem:[%s985_s9 + $0x18] sm:$0xff] %vm572_vm0, %v783_v28  ;;  %592 = vst.msk [vmem:[%s985_s9 + $0x98] sm:$0xff] %vm572_vm0, %v799_v29 }
  0xf3   : > { %v448_v30 = vpop.f32.mrf.mxu0  ;;  %v512_v31 = vpop.f32.mrf.mxu1 }
  0xf4   : > { %574 = vst.msk [vmem:[%s985_s9 + $0x8] sm:$0xff] %vm572_vm0, %v448_v30  ;;  %590 = vst.msk [vmem:[%s985_s9 + $0x88] sm:$0xff] %vm572_vm0, %v512_v31 }
  0xf5   : > { %v786_v32 = vpop.f32.mrf.mxu0  ;;  %v802_v33 = vpop.f32.mrf.mxu1 }
  0xf6   : > { %579 = vst.msk [vmem:[%s985_s9 + $0x30] sm:$0xff] %vm572_vm0, %v786_v32  ;;  %595 = vst.msk [vmem:[%s985_s9 + $0xb0] sm:$0xff] %vm572_vm0, %v802_v33 }
  0xf7   : > { %v461_v34 = vpop.f32.mrf.mxu0  ;;  %v525_v35 = vpop.f32.mrf.mxu1 }
  0xf8   : > { %577 = vst.msk [vmem:[%s985_s9 + $0x20] sm:$0xff] %vm572_vm0, %v461_v34  ;;  %593 = vst.msk [vmem:[%s985_s9 + $0xa0] sm:$0xff] %vm572_vm0, %v525_v35 }
  0xf9   : > { %v787_v36 = vpop.f32.mrf.mxu0  ;;  %v803_v37 = vpop.f32.mrf.mxu1 }
  0xfa   : > { %580 = vst.msk [vmem:[%s985_s9 + $0x38] sm:$0xff] %vm572_vm0, %v787_v36  ;;  %596 = vst.msk [vmem:[%s985_s9 + $0xb8] sm:$0xff] %vm572_vm0, %v803_v37 }
  0xfb   : > { %v464_v38 = vpop.f32.mrf.mxu0  ;;  %v528_v39 = vpop.f32.mrf.mxu1 }
  0xfc   : > { %578 = vst.msk [vmem:[%s985_s9 + $0x28] sm:$0xff] %vm572_vm0, %v464_v38  ;;  %594 = vst.msk [vmem:[%s985_s9 + $0xa8] sm:$0xff] %vm572_vm0, %v528_v39 }
  0xfd   : > { %v790_v40 = vpop.f32.mrf.mxu0  ;;  %v806_v41 = vpop.f32.mrf.mxu1 }
  0xfe   : > { %583 = vst.msk [vmem:[%s985_s9 + $0x50] sm:$0xff] %vm572_vm0, %v790_v40  ;;  %599 = vst.msk [vmem:[%s985_s9 + $0xd0] sm:$0xff] %vm572_vm0, %v806_v41 }
  0xff   : > { %v477_v42 = vpop.f32.mrf.mxu0  ;;  %v541_v43 = vpop.f32.mrf.mxu1 }
 0x100   : > { %581 = vst.msk [vmem:[%s985_s9 + $0x40] sm:$0xff] %vm572_vm0, %v477_v42  ;;  %597 = vst.msk [vmem:[%s985_s9 + $0xc0] sm:$0xff] %vm572_vm0, %v541_v43 }
 0x101   : > { %v791_v44 = vpop.f32.mrf.mxu0  ;;  %v807_v45 = vpop.f32.mrf.mxu1 }
 0x102   : > { %584 = vst.msk [vmem:[%s985_s9 + $0x58] sm:$0xff] %vm572_vm0, %v791_v44  ;;  %600 = vst.msk [vmem:[%s985_s9 + $0xd8] sm:$0xff] %vm572_vm0, %v807_v45 }
 0x103   : > { %v480_v46 = vpop.f32.mrf.mxu0  ;;  %v544_v47 = vpop.f32.mrf.mxu1 }
 0x104   : > { %582 = vst.msk [vmem:[%s985_s9 + $0x48] sm:$0xff] %vm572_vm0, %v480_v46  ;;  %598 = vst.msk [vmem:[%s985_s9 + $0xc8] sm:$0xff] %vm572_vm0, %v544_v47 }
 0x105   : > { %v794_v48 = vpop.f32.mrf.mxu0  ;;  %v810_v49 = vpop.f32.mrf.mxu1 }
 0x106   : > { %587 = vst.msk [vmem:[%s985_s9 + $0x70] sm:$0xff] %vm572_vm0, %v794_v48  ;;  %603 = vst.msk [vmem:[%s985_s9 + $0xf0] sm:$0xff] %vm572_vm0, %v810_v49 }
 0x107   : > { %v493_v50 = vpop.f32.mrf.mxu0  ;;  %v557_v51 = vpop.f32.mrf.mxu1 }
 0x108   : > { %585 = vst.msk [vmem:[%s985_s9 + $0x60] sm:$0xff] %vm572_vm0, %v493_v50  ;;  %601 = vst.msk [vmem:[%s985_s9 + $0xe0] sm:$0xff] %vm572_vm0, %v557_v51 }
 0x109   : > { %v795_v52 = vpop.f32.mrf.mxu0  ;;  %v811_v53 = vpop.f32.mrf.mxu1 }
 0x10a   : > { %588 = vst.msk [vmem:[%s985_s9 + $0x78] sm:$0xff] %vm572_vm0, %v795_v52  ;;  %604 = vst.msk [vmem:[%s985_s9 + $0xf8] sm:$0xff] %vm572_vm0, %v811_v53 }
 0x10b   : > { %v496_v54 = vpop.f32.mrf.mxu0  ;;  %v560_v55 = vpop.f32.mrf.mxu1 }
 0x10c   : > { %586 = vst.msk [vmem:[%s985_s9 + $0x68] sm:$0xff] %vm572_vm0, %v496_v54  ;;  %602 = vst.msk [vmem:[%s985_s9 + $0xe8] sm:$0xff] %vm572_vm0, %v560_v55 }
 0x10d PF: > { %s12_s11 = sadd.s32 1, %s898_s11   ;;  %s1063_s9 = smov %s894_s10 }
 0x10e   : > { %p9_p5 = scmp.ge.s32.totalorder %s12_s11, 4   ;;  %s1064_s10 = smov %s1066_s12 }
 0x110   :  { %11 = sbr.rel (!%p9_p5) target bundleno = 2 (0x2), region = 61 }

// kernel: unet_generator_forward.5
= control target key start
LH: loop header
LB: loop body
LE: loop exit
PB: predicated region body
PF: predicated region fallthrough
CT: control target
= control target key end

     0   :  { %s550_s1 = inlined_call_operand.vmem [shape: bf16[128,16], index: 1, kind: input, shape index: {}]   ;;  %s551_s0 = inlined_call_operand.vmem [shape: bf16[128,128], index: 0, kind: input, shape index: {}]   ;;  %s552_s2 = inlined_call_operand.vmem [shape: f32[128,16], index: 2, kind: output, shape index: {}]  }
   0x1   :  { %v387_v0 = vld [vmem:[%s550_s1 + $0x38] sm:$0xff]   ;;  %v388_v1 = vld [vmem:[%s550_s1 + $0x30] sm:$0xff]   ;;  %v389_v2 = vld [vmem:[%s550_s1 + $0x28] sm:$0xff]  }
   0x2   :  { %339 = vmatprep.subr.bf16.mxu0 %v387_v0  ;;  %371 = vmatprep.subr.bf16.mxu1 %v387_v0  ;;  %v390_v3 = vld [vmem:[%s550_s1 + $0x20] sm:$0xff]   ;;  %v391_v14 = vld [vmem:[%s550_s1 + $0x18] sm:$0xff]   ;;  %v392_v19 = vld [vmem:[%s550_s1 + $0x10] sm:$0xff]  }
   0x3   :  { %340 = vmatpush3.bf16.msra.mxu0 %v387_v0  ;;  %379 = vmatpush3.bf16.msra.mxu1 %v387_v0  ;;  %v13_v4 = vld [vmem:[%s551_s0] sm:$0xf]  ;;  %v14_v5 = vld [vmem:[%s551_s0 + $0x4] sm:$0xf]  ;;  %v15_v20 = vld [vmem:[%s551_s0 + $0x8] sm:$0xf] }
   0x4   :  { %341 = vmatprep.subr.bf16.mxu0 %v388_v1  ;;  %372 = vmatprep.subr.bf16.mxu1 %v388_v1  ;;  %v21_v6 = vld [vmem:[%s551_s0 + $0x20] sm:$0xf]  ;;  %vm29_vm0 = vcmp.gt.bf16.partialorder %v13_v4, 0  ;;  %vm30_vm1 = vcmp.gt.bf16.partialorder %v14_v5, 0  ;;  %v45_v7 = vmul.bf16 1045249613, %v13_v4 }
   0x5   :  { %v46_v8 = vmul.bf16 1045249613, %v14_v5  ;;  %v22_v9 = vld [vmem:[%s551_s0 + $0x24] sm:$0xf]  ;;  %vm37_vm2 = vcmp.gt.bf16.partialorder %v21_v6, 0  ;;  %v393_v22 = vld [vmem:[%s550_s1 + $0x8] sm:$0xff]  }
   0x6   :  { %v53_v10 = vmul.bf16 1045249613, %v21_v6  ;;  %v61_v11 = vsel %vm29_vm0, %v13_v4, %v45_v7  ;;  %vm38_vm3 = vcmp.gt.bf16.partialorder %v22_v9, 0  ;;  %v54_v13 = vmul.bf16 1045249613, %v22_v9  ;;  %v394_v30 = vld [vmem:[%s550_s1] sm:$0xff]  }
   0x7   :  { %342 = vmatpush3.bf16.msra.mxu0 %v388_v1  ;;  %380 = vmatpush3.bf16.msra.mxu1 %v388_v1  ;;  %v62_v12 = vsel %vm30_vm1, %v14_v5, %v46_v8  ;;  %v16_v21 = vld [vmem:[%s551_s0 + $0xc] sm:$0xf]  ;;  %v23_v23 = vld [vmem:[%s551_s0 + $0x28] sm:$0xf]  ;;  %v47_v25 = vmul.bf16 1045249613, %v15_v20 }
   0x8   :  { %343 = vmatprep.subr.bf16.mxu0 %v389_v2  ;;  %373 = vmatprep.subr.bf16.mxu1 %v389_v2  ;;  %v307_v15 = vcombine.low %v61_v11, %v62_v12  ;;  %v69_v16 = vsel %vm37_vm2, %v21_v6, %v53_v10  ;;  %v70_v17 = vsel %vm38_vm3, %v22_v9, %v54_v13  ;;  %v24_v24 = vld [vmem:[%s551_s0 + $0x2c] sm:$0xf]  ;;  %v17_v26 = vld [vmem:[%s551_s0 + $0x10] sm:$0xf]  ;;  %v18_v27 = vld [vmem:[%s551_s0 + $0x14] sm:$0xf] }
   0x9   :  { %v311_v18 = vcombine.low %v69_v16, %v70_v17  ;;  %vm31_vm4 = vcmp.gt.bf16.partialorder %v15_v20, 0  ;;  %vm32_vm5 = vcmp.gt.bf16.partialorder %v16_v21, 0  ;;  %v25_v28 = vld [vmem:[%s551_s0 + $0x30] sm:$0xf]  ;;  %v26_v29 = vld [vmem:[%s551_s0 + $0x34] sm:$0xf] }
   0xa   :  { %355 = vmatprep.mubr.bf16.mxu0 %v307_v15  ;;  %v48_v31 = vmul.bf16 1045249613, %v16_v21  ;;  %vm39_vm6 = vcmp.gt.bf16.partialorder %v23_v23, 0  ;;  %vm40_vm7 = vcmp.gt.bf16.partialorder %v24_v24, 0  ;;  %v55_v32 = vmul.bf16 1045249613, %v23_v23 }
   0xb   :  { %344 = vmatpush3.bf16.msra.mxu0 %v389_v2  ;;  %381 = vmatpush3.bf16.msra.mxu1 %v389_v2  ;;  %v56_v33 = vmul.bf16 1045249613, %v24_v24  ;;  %v49_v34 = vmul.bf16 1045249613, %v17_v26  ;;  %v50_v35 = vmul.bf16 1045249613, %v18_v27  ;;  %v63_v38 = vsel %vm31_vm4, %v15_v20, %v47_v25 }
   0xc   :  { %345 = vmatprep.subr.bf16.mxu0 %v390_v3  ;;  %374 = vmatprep.subr.bf16.mxu1 %v390_v3  ;;  %vm33_vm8 = vcmp.gt.bf16.partialorder %v17_v26, 0  ;;  %vm34_vm9 = vcmp.gt.bf16.partialorder %v18_v27, 0  ;;  %v57_v36 = vmul.bf16 1045249613, %v25_v28  ;;  %v58_v37 = vmul.bf16 1045249613, %v26_v29 }
   0xd   :  { %363 = vmatprep.mubr.bf16.mxu1 %v311_v18  ;;  %vm41_vm10 = vcmp.gt.bf16.partialorder %v25_v28, 0  ;;  %vm42_vm11 = vcmp.gt.bf16.partialorder %v26_v29, 0  ;;  %v64_v39 = vsel %vm32_vm5, %v16_v21, %v48_v31  ;;  %v71_v40 = vsel %vm39_vm6, %v23_v23, %v55_v32  ;;  %v19_v44 = vld [vmem:[%s551_s0 + $0x18] sm:$0xf]  ;;  %v20_v47 = vld [vmem:[%s551_s0 + $0x1c] sm:$0xf] }
   0xe   :  { %v72_v41 = vsel %vm40_vm7, %v24_v24, %v56_v33  ;;  %v65_v42 = vsel %vm33_vm8, %v17_v26, %v49_v34  ;;  %v66_v43 = vsel %vm34_vm9, %v18_v27, %v50_v35  ;;  %v73_v45 = vsel %vm41_vm10, %v25_v28, %v57_v36  ;;  %v27_v48 = vld [vmem:[%s551_s0 + $0x38] sm:$0xf]  ;;  %v28_v49 = vld [vmem:[%s551_s0 + $0x3c] sm:$0xf] }
   0xf   :  { %346 = vmatpush3.bf16.msra.mxu0 %v390_v3  ;;  %382 = vmatpush3.bf16.msra.mxu1 %v390_v3  ;;  %v74_v46 = vsel %vm42_vm11, %v26_v29, %v58_v37  ;;  %v308_v50 = vcombine.low %v63_v38, %v64_v39  ;;  %v312_v51 = vcombine.low %v71_v40, %v72_v41  ;;  %vm35_vm12 = vcmp.gt.bf16.partialorder %v19_v44, 0 }
  0x10   :  { %347 = vmatprep.subr.bf16.mxu0 %v391_v14  ;;  %375 = vmatprep.subr.bf16.mxu1 %v391_v14  ;;  %v309_v52 = vcombine.low %v65_v42, %v66_v43  ;;  %v51_v53 = vmul.bf16 1045249613, %v19_v44  ;;  %v313_v54 = vcombine.low %v73_v45, %v74_v46  ;;  %v52_v55 = vmul.bf16 1045249613, %v20_v47 }
  0x11   :  { %v59_v56 = vmul.bf16 1045249613, %v27_v48  ;;  %v60_v57 = vmul.bf16 1045249613, %v28_v49  ;;  %vm36_vm13 = vcmp.gt.bf16.partialorder %v20_v47, 0  ;;  %vm43_vm14 = vcmp.gt.bf16.partialorder %v27_v48, 0 }
  0x12   :  { %vm44_vm15 = vcmp.gt.bf16.partialorder %v28_v49, 0  ;;  %v67_v58 = vsel %vm35_vm12, %v19_v44, %v51_v53  ;;  %v68_v59 = vsel %vm36_vm13, %v20_v47, %v52_v55  ;;  %vm286_vm0 = vcmask 130048  }
  0x13   :  { %348 = vmatpush3.bf16.msra.mxu0 %v391_v14  ;;  %383 = vmatpush3.bf16.msra.mxu1 %v391_v14  ;;  %v75_v60 = vsel %vm43_vm14, %v27_v48, %v59_v56  ;;  %v76_v61 = vsel %vm44_vm15, %v28_v49, %v60_v57  ;;  %v310_v62 = vcombine.low %v67_v58, %v68_v59 }
  0x14   :  { %349 = vmatprep.subr.bf16.mxu0 %v392_v19  ;;  %376 = vmatprep.subr.bf16.mxu1 %v392_v19  ;;  %v314_v63 = vcombine.low %v75_v60, %v76_v61 }
  0x17   :  { %350 = vmatpush3.bf16.msra.mxu0 %v392_v19  ;;  %384 = vmatpush3.bf16.msra.mxu1 %v392_v19 }
  0x18   :  { %351 = vmatprep.subr.bf16.mxu0 %v393_v22  ;;  %377 = vmatprep.subr.bf16.mxu1 %v393_v22 }
  0x1b   :  { %352 = vmatpush3.bf16.msra.mxu0 %v393_v22  ;;  %385 = vmatpush3.bf16.msra.mxu1 %v393_v22 }
  0x1c   :  { %353 = vmatprep.subr.bf16.mxu0 %v394_v30  ;;  %378 = vmatprep.subr.bf16.mxu1 %v394_v30 }
  0x1f   :  { %354 = vmatpush3.bf16.msra.mxu0 %v394_v30  ;;  %386 = vmatpush3.bf16.msra.mxu1 %v394_v30 }
  0x22   :  { %356 = vmatmul.mubr.bf16.vlgmr.msra.gmra.mxu0 %v308_v50  ;;  %364 = vmatmul.mubr.bf16.vlgmr.msra.gmra.mxu1 %v312_v51 }
  0x23   :  { %359 = vmatprep.mubr.bf16.mxu0 %v309_v52  ;;  %367 = vmatprep.mubr.bf16.mxu1 %v313_v54 }
  0x2a   :  { %360 = vmatmul.mubr.bf16.gmra.mxu0 %v310_v62  ;;  %368 = vmatmul.mubr.bf16.gmra.mxu1 %v314_v63 }
  0xe2   :  { %v357_v0 = vpop.f32.mrf.mxu0  ;;  %v365_v1 = vpop.f32.mrf.mxu1 }
  0xe3   :  { %289 = vst.msk [vmem:[%s552_s2 + $0x10] sm:$0xff] %vm286_vm0, %v357_v0  ;;  %297 = vst.msk [vmem:[%s552_s2 + $0x50] sm:$0xff] %vm286_vm0, %v365_v1 }
  0xe4   :  { %v223_v2 = vpop.f32.mrf.mxu0  ;;  %v255_v3 = vpop.f32.mrf.mxu1 }
  0xe5   :  { %287 = vst.msk [vmem:[%s552_s2] sm:$0xff] %vm286_vm0, %v223_v2  ;;  %295 = vst.msk [vmem:[%s552_s2 + $0x40] sm:$0xff] %vm286_vm0, %v255_v3 }
  0xe6   :  { %v358_v4 = vpop.f32.mrf.mxu0  ;;  %v366_v5 = vpop.f32.mrf.mxu1 }
  0xe7   :  { %290 = vst.msk [vmem:[%s552_s2 + $0x18] sm:$0xff] %vm286_vm0, %v358_v4  ;;  %298 = vst.msk [vmem:[%s552_s2 + $0x58] sm:$0xff] %vm286_vm0, %v366_v5 }
  0xe8   :  { %v226_v6 = vpop.f32.mrf.mxu0  ;;  %v258_v7 = vpop.f32.mrf.mxu1 }
  0xe9   :  { %288 = vst.msk [vmem:[%s552_s2 + $0x8] sm:$0xff] %vm286_vm0, %v226_v6  ;;  %296 = vst.msk [vmem:[%s552_s2 + $0x48] sm:$0xff] %vm286_vm0, %v258_v7 }
  0xea   :  { %v361_v8 = vpop.f32.mrf.mxu0  ;;  %v369_v9 = vpop.f32.mrf.mxu1 }
  0xeb   :  { %293 = vst.msk [vmem:[%s552_s2 + $0x30] sm:$0xff] %vm286_vm0, %v361_v8  ;;  %301 = vst.msk [vmem:[%s552_s2 + $0x70] sm:$0xff] %vm286_vm0, %v369_v9 }
  0xec   :  { %v239_v10 = vpop.f32.mrf.mxu0  ;;  %v271_v11 = vpop.f32.mrf.mxu1 }
  0xed   :  { %291 = vst.msk [vmem:[%s552_s2 + $0x20] sm:$0xff] %vm286_vm0, %v239_v10  ;;  %299 = vst.msk [vmem:[%s552_s2 + $0x60] sm:$0xff] %vm286_vm0, %v271_v11 }
  0xee   :  { %v362_v12 = vpop.f32.mrf.mxu0  ;;  %v370_v13 = vpop.f32.mrf.mxu1 }
  0xef   :  { %294 = vst.msk [vmem:[%s552_s2 + $0x38] sm:$0xff] %vm286_vm0, %v362_v12  ;;  %302 = vst.msk [vmem:[%s552_s2 + $0x78] sm:$0xff] %vm286_vm0, %v370_v13 }
  0xf0   :  { %v242_v14 = vpop.f32.mrf.mxu0  ;;  %v274_v15 = vpop.f32.mrf.mxu1 }
  0xf1   :  { %292 = vst.msk [vmem:[%s552_s2 + $0x28] sm:$0xff] %vm286_vm0, %v242_v14  ;;  %300 = vst.msk [vmem:[%s552_s2 + $0x68] sm:$0xff] %vm286_vm0, %v274_v15 }

// kernel: unet_generator_forward.6
= control target key start
LH: loop header
LB: loop body
LE: loop exit
PB: predicated region body
PF: predicated region fallthrough
CT: control target
= control target key end

     0   :  { %v726_v0 = vmov 0.0   ;;  %vm727_vm0 = vmmov 0   ;;  %v728_v12 = vmov 0   ;;  %s949_s1 = inlined_call_operand.vmem [shape: bf16[128,128], index: 1, kind: input, shape index: {}]   ;;  %s950_s0 = inlined_call_operand.vmem [shape: bf16[200,128], index: 0, kind: input, shape index: {}]   ;;  %s951_s2 = inlined_call_operand.vmem [shape: bf16[200,128], index: 2, kind: output, shape index: {}]  }
   0x1   :  { %631 = vmatprep.subr.bf16.mxu0 %v726_v0  ;;  %v718_v1 = vld [vmem:[%s949_s1 + $0x38] sm:$0xff]   ;;  %699 = vmatprep.subr.bf16.mxu1 %v726_v0  ;;  %v719_v2 = vld [vmem:[%s949_s1 + $0x30] sm:$0xff]   ;;  %v720_v3 = vld [vmem:[%s949_s1 + $0x28] sm:$0xff]  }
   0x2   :  { %647 = vmatprep.mubr.msk.bf16.mxu0 %vm727_vm0, %v726_v0  ;;  %675 = vmatprep.mubr.msk.bf16.mxu1 %vm727_vm0, %v726_v0  ;;  %v721_v4 = vld [vmem:[%s949_s1 + $0x20] sm:$0xff]   ;;  %v722_v5 = vld [vmem:[%s949_s1 + $0x18] sm:$0xff]   ;;  %v723_v6 = vld [vmem:[%s949_s1 + $0x10] sm:$0xff]  }
   0x3   :  { %632 = vmatpush3.bf16.msra.mxu0 %v718_v1  ;;  %707 = vmatpush3.bf16.msra.mxu1 %v718_v1  ;;  %v724_v7 = vld [vmem:[%s949_s1 + $0x8] sm:$0xff]   ;;  %v12_v8 = vld [vmem:[%s950_s0] sm:$0xf]  ;;  %v13_v9 = vld [vmem:[%s950_s0 + $0x4] sm:$0xf] }
   0x4   :  { %633 = vmatprep.subr.bf16.mxu0 %v726_v0  ;;  %700 = vmatprep.subr.bf16.mxu1 %v726_v0  ;;  %v26_v10 = vld [vmem:[%s950_s0 + $0x38] sm:$0xf]  ;;  %v27_v11 = vld [vmem:[%s950_s0 + $0x3c] sm:$0xf]  ;;  %v37_v13 = vmax.bf16 %v728_v12, %v12_v8  ;;  %v38_v14 = vmax.bf16 %v728_v12, %v13_v9  ;;  %v725_v17 = vld [vmem:[%s949_s1] sm:$0xff]  }
   0x5   :  { %v51_v15 = vmax.bf16 %v728_v12, %v26_v10  ;;  %v52_v16 = vmax.bf16 %v728_v12, %v27_v11  ;;  %v14_v20 = vld [vmem:[%s950_s0 + $0x8] sm:$0xf]  ;;  %v15_v21 = vld [vmem:[%s950_s0 + $0xc] sm:$0xf]  ;;  %v28_v22 = vld [vmem:[%s950_s0 + $0x40] sm:$0xf] }
   0x6   :  { %v468_v18 = vcombine.low %v37_v13, %v38_v14  ;;  %v29_v23 = vld [vmem:[%s950_s0 + $0x44] sm:$0xf]  ;;  %v39_v24 = vmax.bf16 %v728_v12, %v14_v20  ;;  %v40_v25 = vmax.bf16 %v728_v12, %v15_v21  ;;  %v53_v26 = vmax.bf16 %v728_v12, %v28_v22  ;;  %v16_v30 = vld [vmem:[%s950_s0 + $0x10] sm:$0xf]  ;;  %v17_v31 = vld [vmem:[%s950_s0 + $0x14] sm:$0xf] }
   0x7   :  { %634 = vmatpush3.bf16.msra.mxu0 %v719_v2  ;;  %708 = vmatpush3.bf16.msra.mxu1 %v719_v2  ;;  %v475_v19 = vcombine.low %v51_v15, %v52_v16  ;;  %v54_v27 = vmax.bf16 %v728_v12, %v29_v23  ;;  %v30_v32 = vld [vmem:[%s950_s0 + $0x48] sm:$0xf]  ;;  %v31_v33 = vld [vmem:[%s950_s0 + $0x4c] sm:$0xf]  ;;  %v41_v34 = vmax.bf16 %v728_v12, %v16_v30  ;;  %v18_v40 = vld [vmem:[%s950_s0 + $0x18] sm:$0xf] }
   0x8   :  { %635 = vmatprep.subr.bf16.mxu0 %v726_v0  ;;  %701 = vmatprep.subr.bf16.mxu1 %v726_v0  ;;  %v469_v28 = vcombine.low %v39_v24, %v40_v25  ;;  %v42_v35 = vmax.bf16 %v728_v12, %v17_v31  ;;  %v55_v36 = vmax.bf16 %v728_v12, %v30_v32  ;;  %v19_v41 = vld [vmem:[%s950_s0 + $0x1c] sm:$0xf]  ;;  %v32_v42 = vld [vmem:[%s950_s0 + $0x50] sm:$0xf]  ;;  %v33_v43 = vld [vmem:[%s950_s0 + $0x54] sm:$0xf] }
   0x9   :  { %v476_v29 = vcombine.low %v53_v26, %v54_v27  ;;  %v56_v37 = vmax.bf16 %v728_v12, %v31_v33  ;;  %v43_v44 = vmax.bf16 %v728_v12, %v18_v40  ;;  %v44_v45 = vmax.bf16 %v728_v12, %v19_v41  ;;  %v20_v50 = vld [vmem:[%s950_s0 + $0x20] sm:$0xf]  ;;  %v21_v51 = vld [vmem:[%s950_s0 + $0x24] sm:$0xf]  ;;  %v34_v52 = vld [vmem:[%s950_s0 + $0x58] sm:$0xf] }
   0xa   :  { %v470_v38 = vcombine.low %v41_v34, %v42_v35  ;;  %v57_v46 = vmax.bf16 %v728_v12, %v32_v42  ;;  %v58_v47 = vmax.bf16 %v728_v12, %v33_v43  ;;  %v35_v53 = vld [vmem:[%s950_s0 + $0x5c] sm:$0xf]  ;;  %v45_v54 = vmax.bf16 %v728_v12, %v20_v50  ;;  %v22_v60 = vld [vmem:[%s950_s0 + $0x28] sm:$0xf]  ;;  %v23_v61 = vld [vmem:[%s950_s0 + $0x2c] sm:$0xf] }
   0xb   :  { %636 = vmatpush3.bf16.msra.mxu0 %v720_v3  ;;  %709 = vmatpush3.bf16.msra.mxu1 %v720_v3  ;;  %v477_v39 = vcombine.low %v55_v36, %v56_v37  ;;  %v471_v48 = vcombine.low %v43_v44, %v44_v45  ;;  %v46_v55 = vmax.bf16 %v728_v12, %v21_v51  ;;  %v36_v62 = vld [vmem:[%s950_s0 + $0x60] sm:$0xf] }
   0xc   :  { %637 = vmatprep.subr.bf16.mxu0 %v726_v0  ;;  %702 = vmatprep.subr.bf16.mxu1 %v726_v0  ;;  %v478_v49 = vcombine.low %v57_v46, %v58_v47  ;;  %v59_v56 = vmax.bf16 %v728_v12, %v34_v52  ;;  %v60_v57 = vmax.bf16 %v728_v12, %v35_v53 }
   0xd   :  { %v472_v58 = vcombine.low %v45_v54, %v46_v55  ;;  %v47_v63 = vmax.bf16 %v728_v12, %v22_v60  ;;  %v48_v1 = vmax.bf16 %v728_v12, %v23_v61  ;;  %v61_v2 = vmax.bf16 %v728_v12, %v36_v62 }
   0xe   :  { %v479_v59 = vcombine.low %v59_v56, %v60_v57 }
   0xf   :  { %638 = vmatpush3.bf16.msra.mxu0 %v721_v4  ;;  %710 = vmatpush3.bf16.msra.mxu1 %v721_v4  ;;  %v473_v3 = vcombine.low %v47_v63, %v48_v1  ;;  %v480_v4 = vcombine.low %v61_v2, %v61_v2 }
  0x10   :  { %639 = vmatprep.subr.bf16.mxu0 %v726_v0  ;;  %703 = vmatprep.subr.bf16.mxu1 %v726_v0 }
  0x13   :  { %640 = vmatpush3.bf16.msra.mxu0 %v722_v5  ;;  %711 = vmatpush3.bf16.msra.mxu1 %v722_v5  ;;  %v24_v5 = vld [vmem:[%s950_s0 + $0x30] sm:$0xf] }
  0x14   :  { %641 = vmatprep.subr.bf16.mxu0 %v726_v0  ;;  %704 = vmatprep.subr.bf16.mxu1 %v726_v0 }
  0x17   :  { %642 = vmatpush3.bf16.msra.mxu0 %v723_v6  ;;  %712 = vmatpush3.bf16.msra.mxu1 %v723_v6  ;;  %v25_v6 = vld [vmem:[%s950_s0 + $0x34] sm:$0xf] }
  0x18   :  { %643 = vmatprep.subr.bf16.mxu0 %v726_v0  ;;  %705 = vmatprep.subr.bf16.mxu1 %v726_v0  ;;  %v50_v8 = vmax.bf16 %v728_v12, %v25_v6 }
  0x1b   :  { %644 = vmatpush3.bf16.msra.mxu0 %v724_v7  ;;  %713 = vmatpush3.bf16.msra.mxu1 %v724_v7  ;;  %v49_v7 = vmax.bf16 %v728_v12, %v24_v5 }
  0x1c   :  { %645 = vmatprep.subr.bf16.mxu0 %v726_v0  ;;  %706 = vmatprep.subr.bf16.mxu1 %v726_v0 }
  0x1d   :  { %v474_v9 = vcombine.low %v49_v7, %v50_v8 }
  0x1f   :  { %646 = vmatpush3.bf16.msra.mxu0 %v725_v17  ;;  %714 = vmatpush3.bf16.msra.mxu1 %v725_v17 }
  0x22   :  { %648 = vmatmul.mubr.bf16.vlgmr.msra.gmra.mxu0 %v468_v18  ;;  %676 = vmatmul.mubr.bf16.vlgmr.msra.gmra.mxu1 %v475_v19 }
  0x23   :  { %651 = vmatprep.mubr.msk.bf16.mxu0 %vm727_vm0, %v726_v0  ;;  %679 = vmatprep.mubr.msk.bf16.mxu1 %vm727_vm0, %v726_v0 }
  0x2a   :  { %652 = vmatmul.mubr.bf16.gmra.mxu0 %v469_v28  ;;  %680 = vmatmul.mubr.bf16.gmra.mxu1 %v476_v29 }
  0x2b   :  { %655 = vmatprep.mubr.msk.bf16.mxu0 %vm727_vm0, %v726_v0  ;;  %683 = vmatprep.mubr.msk.bf16.mxu1 %vm727_vm0, %v726_v0 }
  0x32   :  { %656 = vmatmul.mubr.bf16.gmra.mxu0 %v470_v38  ;;  %684 = vmatmul.mubr.bf16.gmra.mxu1 %v477_v39 }
  0x33   :  { %659 = vmatprep.mubr.msk.bf16.mxu0 %vm727_vm0, %v726_v0  ;;  %687 = vmatprep.mubr.msk.bf16.mxu1 %vm727_vm0, %v726_v0 }
  0x3a   :  { %660 = vmatmul.mubr.bf16.gmra.mxu0 %v471_v48  ;;  %688 = vmatmul.mubr.bf16.gmra.mxu1 %v478_v49 }
  0x3b   :  { %663 = vmatprep.mubr.msk.bf16.mxu0 %vm727_vm0, %v726_v0  ;;  %691 = vmatprep.mubr.msk.bf16.mxu1 %vm727_vm0, %v726_v0 }
  0x42   :  { %664 = vmatmul.mubr.bf16.gmra.mxu0 %v472_v58  ;;  %692 = vmatmul.mubr.bf16.gmra.mxu1 %v479_v59 }
  0x43   :  { %667 = vmatprep.mubr.msk.bf16.mxu0 %vm727_vm0, %v726_v0  ;;  %695 = vmatprep.mubr.msk.bf16.mxu1 %vm727_vm0, %v726_v0 }
  0x4a   :  { %668 = vmatmul.mubr.bf16.gmra.mxu0 %v473_v3  ;;  %696 = vmatmul.mubr.bf16.gmra.mxu1 %v480_v4 }
  0x4b   :  { %671 = vmatprep.mubr.msk.bf16.mxu0 %vm727_vm0, %v726_v0 }
  0x52   :  { %672 = vmatmul.mubr.bf16.gmra.mxu0 %v474_v9 }
  0xe2   :  { %v236_v10 = vpop.f32.mrf.mxu0  ;;  %v292_v11 = vpop.f32.mrf.mxu1 }
  0xe4   :  { %v649_v13 = vpop.f32.mrf.mxu0  ;;  %v677_v14 = vpop.f32.mrf.mxu1 }
  0xe6   :  { %v239_v15 = vpop.f32.mrf.mxu0  ;;  %v295_v16 = vpop.f32.mrf.mxu1 }
  0xe7   :  { %v542_v17 = vpack.c.bf16 %v239_v15, %v236_v10  ;;  %v577_v18 = vpack.c.bf16 %v295_v16, %v292_v11 }
  0xe8   :  { %v650_v19 = vpop.f32.mrf.mxu0  ;;  %v678_v20 = vpop.f32.mrf.mxu1 }
  0xe9   :  { %543 = vst [vmem:[%s951_s2] sm:$0xff] %v542_v17   ;;  %605 = vst [vmem:[%s951_s2 + $0x38] sm:$0xff] %v577_v18  }
  0xea   :  { %v244_v0 = vpop.f32.mrf.mxu0  ;;  %v300_v12 = vpop.f32.mrf.mxu1 }
  0xec   :  { %v653_v21 = vpop.f32.mrf.mxu0  ;;  %v681_v22 = vpop.f32.mrf.mxu1 }
  0xee   :  { %v247_v23 = vpop.f32.mrf.mxu0  ;;  %v303_v24 = vpop.f32.mrf.mxu1 }
  0xef   :  { %v547_v25 = vpack.c.bf16 %v247_v23, %v244_v0  ;;  %v582_v26 = vpack.c.bf16 %v303_v24, %v300_v12 }
  0xf0   :  { %v654_v27 = vpop.f32.mrf.mxu0  ;;  %v682_v28 = vpop.f32.mrf.mxu1 }
  0xf1   :  { %599 = vst [vmem:[%s951_s2 + $0x8] sm:$0xff] %v547_v25   ;;  %606 = vst [vmem:[%s951_s2 + $0x40] sm:$0xff] %v582_v26  }
  0xf2   :  { %v252_v29 = vpop.f32.mrf.mxu0  ;;  %v308_v30 = vpop.f32.mrf.mxu1 }
  0xf4   :  { %v657_v31 = vpop.f32.mrf.mxu0  ;;  %v685_v32 = vpop.f32.mrf.mxu1 }
  0xf6   :  { %v255_v33 = vpop.f32.mrf.mxu0  ;;  %v311_v34 = vpop.f32.mrf.mxu1 }
  0xf7   :  { %v552_v35 = vpack.c.bf16 %v255_v33, %v252_v29  ;;  %v587_v36 = vpack.c.bf16 %v311_v34, %v308_v30 }
  0xf8   :  { %v658_v37 = vpop.f32.mrf.mxu0  ;;  %v686_v38 = vpop.f32.mrf.mxu1 }
  0xf9   :  { %600 = vst [vmem:[%s951_s2 + $0x10] sm:$0xff] %v552_v35   ;;  %607 = vst [vmem:[%s951_s2 + $0x48] sm:$0xff] %v587_v36  }
  0xfa   :  { %v260_v39 = vpop.f32.mrf.mxu0  ;;  %v316_v40 = vpop.f32.mrf.mxu1 }
  0xfc   :  { %v661_v41 = vpop.f32.mrf.mxu0  ;;  %v689_v42 = vpop.f32.mrf.mxu1 }
  0xfe   :  { %v263_v43 = vpop.f32.mrf.mxu0  ;;  %v319_v44 = vpop.f32.mrf.mxu1 }
  0xff   :  { %v557_v45 = vpack.c.bf16 %v263_v43, %v260_v39  ;;  %v592_v46 = vpack.c.bf16 %v319_v44, %v316_v40 }
 0x100   :  { %v662_v47 = vpop.f32.mrf.mxu0  ;;  %v690_v48 = vpop.f32.mrf.mxu1 }
 0x101   :  { %601 = vst [vmem:[%s951_s2 + $0x18] sm:$0xff] %v557_v45   ;;  %608 = vst [vmem:[%s951_s2 + $0x50] sm:$0xff] %v592_v46  }
 0x102   :  { %v268_v49 = vpop.f32.mrf.mxu0  ;;  %v324_v50 = vpop.f32.mrf.mxu1 }
 0x104   :  { %v665_v51 = vpop.f32.mrf.mxu0  ;;  %v693_v52 = vpop.f32.mrf.mxu1 }
 0x106   :  { %v271_v53 = vpop.f32.mrf.mxu0  ;;  %v327_v54 = vpop.f32.mrf.mxu1 }
 0x107   :  { %v562_v55 = vpack.c.bf16 %v271_v53, %v268_v49  ;;  %v597_v56 = vpack.c.bf16 %v327_v54, %v324_v50 }
 0x108   :  { %v666_v57 = vpop.f32.mrf.mxu0  ;;  %v694_v58 = vpop.f32.mrf.mxu1 }
 0x109   :  { %602 = vst [vmem:[%s951_s2 + $0x20] sm:$0xff] %v562_v55   ;;  %609 = vst [vmem:[%s951_s2 + $0x58] sm:$0xff] %v597_v56  }
 0x10a   :  { %v276_v59 = vpop.f32.mrf.mxu0  ;;  %v332_v60 = vpop.f32.mrf.mxu1 }
 0x10b   :  { %v538_v61 = vpack.c.bf16 %v332_v60, %v332_v60 }
 0x10c   :  { %v669_v62 = vpop.f32.mrf.mxu0  ;;  %v697_v63 = vpop.f32.mrf.mxu1 }
 0x10d   :  { %463 = vst [vmem:[%s951_s2 + $0x60] sm:$0xf] %v538_v61 }
 0x10e   :  { %v279_v1 = vpop.f32.mrf.mxu0  ;;  %v335_v2 = vpop.f32.mrf.mxu1 }
 0x10f   :  { %v567_v3 = vpack.c.bf16 %v279_v1, %v276_v59 }
 0x110   :  { %v670_v4 = vpop.f32.mrf.mxu0  ;;  %v698_v5 = vpop.f32.mrf.mxu1 }
 0x111   :  { %603 = vst [vmem:[%s951_s2 + $0x28] sm:$0xff] %v567_v3  }
 0x112   :  { %v284_v6 = vpop.f32.mrf.mxu0 }
 0x114   :  { %v673_v7 = vpop.f32.mrf.mxu0 }
 0x116   :  { %v287_v8 = vpop.f32.mrf.mxu0 }
 0x117   :  { %v572_v9 = vpack.c.bf16 %v287_v8, %v284_v6 }
 0x118   :  { %v674_v10 = vpop.f32.mrf.mxu0 }
 0x119   :  { %604 = vst [vmem:[%s951_s2 + $0x30] sm:$0xff] %v572_v9  }

// kernel: unet_generator_forward.7
= control target key start
LH: loop header
LB: loop body
LE: loop exit
PB: predicated region body
PF: predicated region fallthrough
CT: control target
= control target key end

     0   :  { %v1720_v0 = vmov 0.0   ;;  %vm1721_vm0 = vmmov 0   ;;  %v1722_v14 = vmov 0   ;;  %vm1167_vm1 = vcmask 388096   ;;  %s2764_s1 = inlined_call_operand.vmem [shape: bf16[128,48], index: 1, kind: input, shape index: {}]   ;;  %s2765_s0 = inlined_call_operand.vmem [shape: bf16[648,128], index: 0, kind: input, shape index: {}]   ;;  %s2766_s2 = inlined_call_operand.vmem [shape: bf16[648,48], index: 2, kind: output, shape index: {}]  }
   0x1   :  { %1513 = vmatprep.subr.bf16.mxu0 %v1720_v0  ;;  %v1712_v1 = vld [vmem:[%s2764_s1 + $0x38] sm:$0xff]   ;;  %1693 = vmatprep.subr.bf16.mxu1 %v1720_v0  ;;  %v1713_v2 = vld [vmem:[%s2764_s1 + $0x30] sm:$0xff]   ;;  %v1714_v3 = vld [vmem:[%s2764_s1 + $0x28] sm:$0xff]  }
   0x2   :  { %1529 = vmatprep.mubr.msk.bf16.mxu0 %vm1721_vm0, %v1720_v0  ;;  %1613 = vmatprep.mubr.msk.bf16.mxu1 %vm1721_vm0, %v1720_v0  ;;  %v1715_v4 = vld [vmem:[%s2764_s1 + $0x20] sm:$0xff]   ;;  %v1716_v5 = vld [vmem:[%s2764_s1 + $0x18] sm:$0xff]   ;;  %v54_v8 = vld [vmem:[%s2765_s0 + $0xa8] sm:$0xf] }
   0x3   :  { %1514 = vmatpush3.bf16.msra.mxu0 %v1712_v1  ;;  %1701 = vmatpush3.bf16.msra.mxu1 %v1712_v1  ;;  %v12_v6 = vld [vmem:[%s2765_s0] sm:$0xf]  ;;  %v13_v7 = vld [vmem:[%s2765_s0 + $0x4] sm:$0xf]  ;;  %v55_v9 = vld [vmem:[%s2765_s0 + $0xac] sm:$0xf]  ;;  %v1801_v18 = vmax.bf16 %v1722_v14, %v54_v8 }
   0x4   :  { %1515 = vmatprep.subr.bf16.mxu0 %v1720_v0  ;;  %1694 = vmatprep.subr.bf16.mxu1 %v1720_v0  ;;  %v14_v10 = vld [vmem:[%s2765_s0 + $0x8] sm:$0xf]  ;;  %v15_v11 = vld [vmem:[%s2765_s0 + $0xc] sm:$0xf]  ;;  %v56_v12 = vld [vmem:[%s2765_s0 + $0xb0] sm:$0xf]  ;;  %v1792_v15 = vmax.bf16 %v1722_v14, %v12_v6  ;;  %v1795_v16 = vmax.bf16 %v1722_v14, %v13_v7  ;;  %v1804_v19 = vmax.bf16 %v1722_v14, %v55_v9 }
   0x5   :  { %v57_v13 = vld [vmem:[%s2765_s0 + $0xb4] sm:$0xf]  ;;  %v1807_v20 = vmax.bf16 %v1722_v14, %v14_v10  ;;  %v1812_v21 = vmax.bf16 %v1722_v14, %v15_v11  ;;  %v1815_v22 = vmax.bf16 %v1722_v14, %v56_v12  ;;  %v28_v24 = vld [vmem:[%s2765_s0 + $0x40] sm:$0xf]  ;;  %v29_v25 = vld [vmem:[%s2765_s0 + $0x44] sm:$0xf] }
   0x6   :  { %v1717_v17 = vld [vmem:[%s2764_s1 + $0x10] sm:$0xff]   ;;  %v1818_v23 = vmax.bf16 %v1722_v14, %v57_v13  ;;  %v1718_v26 = vld [vmem:[%s2764_s1 + $0x8] sm:$0xff]   ;;  %v1253_v29 = vcombine.low %v1792_v15, %v1795_v16  ;;  %v1274_v33 = vcombine.low %v1801_v18, %v1804_v19  ;;  %v1849_v34 = vmax.bf16 %v1722_v14, %v28_v24  ;;  %v74_v42 = vld [vmem:[%s2765_s0 + $0xf8] sm:$0xf] }
   0x7   :  { %1516 = vmatpush3.bf16.msra.mxu0 %v1713_v2  ;;  %1702 = vmatpush3.bf16.msra.mxu1 %v1713_v2  ;;  %v70_v27 = vld [vmem:[%s2765_s0 + $0xe8] sm:$0xf]  ;;  %v71_v28 = vld [vmem:[%s2765_s0 + $0xec] sm:$0xf]  ;;  %v72_v32 = vld [vmem:[%s2765_s0 + $0xf0] sm:$0xf]  ;;  %v1852_v35 = vmax.bf16 %v1722_v14, %v29_v25  ;;  %v1254_v39 = vcombine.low %v1807_v20, %v1812_v21  ;;  %v1921_v59 = vmax.bf16 %v1722_v14, %v74_v42 }
   0x8   :  { %1517 = vmatprep.subr.bf16.mxu0 %v1720_v0  ;;  %1695 = vmatprep.subr.bf16.mxu1 %v1720_v0  ;;  %v30_v30 = vld [vmem:[%s2765_s0 + $0x48] sm:$0xf]  ;;  %v31_v31 = vld [vmem:[%s2765_s0 + $0x4c] sm:$0xf]  ;;  %v73_v36 = vld [vmem:[%s2765_s0 + $0xf4] sm:$0xf]  ;;  %v1275_v40 = vcombine.low %v1815_v22, %v1818_v23  ;;  %v1870_v41 = vmax.bf16 %v1722_v14, %v70_v27  ;;  %v1881_v45 = vmax.bf16 %v1722_v14, %v71_v28 }
   0x9   :  { %v32_v37 = vld [vmem:[%s2765_s0 + $0x50] sm:$0xf]  ;;  %v33_v38 = vld [vmem:[%s2765_s0 + $0x54] sm:$0xf]  ;;  %v1719_v43 = vld [vmem:[%s2764_s1] sm:$0xff]   ;;  %v1261_v44 = vcombine.low %v1849_v34, %v1852_v35  ;;  %v1884_v46 = vmax.bf16 %v1722_v14, %v30_v30  ;;  %v1887_v47 = vmax.bf16 %v1722_v14, %v31_v31  ;;  %v1896_v50 = vmax.bf16 %v1722_v14, %v72_v32 }
   0xa   :  { %v75_v48 = vld [vmem:[%s2765_s0 + $0xfc] sm:$0xf]  ;;  %v34_v49 = vld [vmem:[%s2765_s0 + $0x58] sm:$0xf]  ;;  %v1899_v51 = vmax.bf16 %v1722_v14, %v73_v36  ;;  %v1902_v52 = vmax.bf16 %v1722_v14, %v32_v37  ;;  %v1905_v53 = vmax.bf16 %v1722_v14, %v33_v38  ;;  %v76_v55 = vld [vmem:[%s2765_s0 + $0x100] sm:$0xf] }
   0xb   :  { %1518 = vmatpush3.bf16.msra.mxu0 %v1714_v3  ;;  %1703 = vmatpush3.bf16.msra.mxu1 %v1714_v3  ;;  %v35_v54 = vld [vmem:[%s2765_s0 + $0x5c] sm:$0xf]  ;;  %v77_v56 = vld [vmem:[%s2765_s0 + $0x104] sm:$0xf]  ;;  %v36_v60 = vld [vmem:[%s2765_s0 + $0x60] sm:$0xf]  ;;  %v1939_v2 = vmax.bf16 %v1722_v14, %v75_v48  ;;  %v1951_v6 = vmax.bf16 %v1722_v14, %v76_v55 }
   0xc   :  { %1519 = vmatprep.subr.bf16.mxu0 %v1720_v0  ;;  %1696 = vmatprep.subr.bf16.mxu1 %v1720_v0  ;;  %v37_v61 = vld [vmem:[%s2765_s0 + $0x64] sm:$0xf]  ;;  %v78_v62 = vld [vmem:[%s2765_s0 + $0x108] sm:$0xf]  ;;  %v79_v3 = vld [vmem:[%s2765_s0 + $0x10c] sm:$0xf]  ;;  %v1954_v7 = vmax.bf16 %v1722_v14, %v77_v56  ;;  %v1968_v12 = vmax.bf16 %v1722_v14, %v36_v60  ;;  %v2770_v34 = vcombine.low %v1902_v52, %v1905_v53 }
   0xd   :  { %v38_v8 = vld [vmem:[%s2765_s0 + $0x68] sm:$0xf]  ;;  %v39_v9 = vld [vmem:[%s2765_s0 + $0x6c] sm:$0xf]  ;;  %v80_v10 = vld [vmem:[%s2765_s0 + $0x110] sm:$0xf]  ;;  %v1971_v13 = vmax.bf16 %v1722_v14, %v37_v61  ;;  %v1990_v30 = vmax.bf16 %v1722_v14, %v79_v3  ;;  %v2771_v35 = vcombine.low %v1921_v59, %v1939_v2 }
   0xe   :  { %v81_v24 = vld [vmem:[%s2765_s0 + $0x114] sm:$0xf]  ;;  %v40_v25 = vld [vmem:[%s2765_s0 + $0x70] sm:$0xf]  ;;  %v82_v31 = vld [vmem:[%s2765_s0 + $0x118] sm:$0xf]  ;;  %v2001_v37 = vmax.bf16 %v1722_v14, %v38_v8  ;;  %v2004_v38 = vmax.bf16 %v1722_v14, %v39_v9  ;;  %v2007_v42 = vmax.bf16 %v1722_v14, %v80_v10 }
   0xf   :  { %1520 = vmatpush3.bf16.msra.mxu0 %v1715_v4  ;;  %1704 = vmatpush3.bf16.msra.mxu1 %v1715_v4  ;;  %v1945_v4 = vmax.bf16 %v1722_v14, %v34_v49  ;;  %v83_v32 = vld [vmem:[%s2765_s0 + $0x11c] sm:$0xf]  ;;  %v2021_v55 = vmax.bf16 %v1722_v14, %v40_v25  ;;  %v84_v60 = vld [vmem:[%s2765_s0 + $0x120] sm:$0xf]  ;;  %v85_v61 = vld [vmem:[%s2765_s0 + $0x124] sm:$0xf]  ;;  %v2044_v8 = vmax.bf16 %v1722_v14, %v82_v31 }
  0x10   :  { %1521 = vmatprep.subr.bf16.mxu0 %v1720_v0  ;;  %1697 = vmatprep.subr.bf16.mxu1 %v1720_v0  ;;  %v43_v48 = vld [vmem:[%s2765_s0 + $0x7c] sm:$0xf]  ;;  %v2047_v9 = vmax.bf16 %v1722_v14, %v83_v32  ;;  %v45_v10 = vld [vmem:[%s2765_s0 + $0x84] sm:$0xf]  ;;  %v86_v15 = vld [vmem:[%s2765_s0 + $0x128] sm:$0xf]  ;;  %v2081_v31 = vmax.bf16 %v1722_v14, %v84_v60  ;;  %v2084_v32 = vmax.bf16 %v1722_v14, %v85_v61 }
  0x11   :  { %v87_v16 = vld [vmem:[%s2765_s0 + $0x12c] sm:$0xf]  ;;  %v2090_v19 = vmax.bf16 %v1722_v14, %v45_v10  ;;  %v2093_v18 = vmax.bf16 %v1722_v14, %v86_v15  ;;  %v17_v15 = vld [vmem:[%s2765_s0 + $0x14] sm:$0xf]  ;;  %v59_v60 = vld [vmem:[%s2765_s0 + $0xbc] sm:$0xf] }
  0x12   :  { %v2096_v25 = vmax.bf16 %v1722_v14, %v87_v16  ;;  %v58_v16 = vld [vmem:[%s2765_s0 + $0xb8] sm:$0xf]  ;;  %v88_v3 = vld [vmem:[%s2765_s0 + $0x130] sm:$0xf]  ;;  %v89_v49 = vld [vmem:[%s2765_s0 + $0x134] sm:$0xf]  ;;  %v2779_v52 = vcombine.low %v2044_v8, %v2047_v9  ;;  %v2781_v59 = vcombine.low %v2081_v31, %v2084_v32 }
  0x13   :  { %1522 = vmatpush3.bf16.msra.mxu0 %v1716_v5  ;;  %1705 = vmatpush3.bf16.msra.mxu1 %v1716_v5  ;;  %v1948_v5 = vmax.bf16 %v1722_v14, %v35_v54  ;;  %v2018_v54 = vmax.bf16 %v1722_v14, %v81_v24  ;;  %v47_v24 = vld [vmem:[%s2765_s0 + $0x8c] sm:$0xf]  ;;  %v2134_v28 = vmax.bf16 %v1722_v14, %v88_v3  ;;  %v48_v21 = vld [vmem:[%s2765_s0 + $0x90] sm:$0xf]  ;;  %v49_v22 = vld [vmem:[%s2765_s0 + $0x94] sm:$0xf] }
  0x14   :  { %1523 = vmatprep.subr.bf16.mxu0 %v1720_v0  ;;  %1698 = vmatprep.subr.bf16.mxu1 %v1720_v0  ;;  %v2109_v10 = vmax.bf16 %v1722_v14, %v47_v24  ;;  %v2137_v61 = vmax.bf16 %v1722_v14, %v89_v49  ;;  %v98_v24 = vmax.bf16 %v1722_v14, %v17_v15  ;;  %v18_v3 = vld [vmem:[%s2765_s0 + $0x18] sm:$0xf]  ;;  %v19_v15 = vld [vmem:[%s2765_s0 + $0x1c] sm:$0xf]  ;;  %v21_v11 = vld [vmem:[%s2765_s0 + $0x24] sm:$0xf] }
  0x15   :  { %v2161_v23 = vmax.bf16 %v1722_v14, %v48_v21  ;;  %v23_v58 = vld [vmem:[%s2765_s0 + $0x2c] sm:$0xf] }
  0x17   :  { %1524 = vmatpush3.bf16.msra.mxu0 %v1717_v17  ;;  %1706 = vmatpush3.bf16.msra.mxu1 %v1717_v17  ;;  %v1974_v17 = vmax.bf16 %v1722_v14, %v78_v62  ;;  %v44_v62 = vld [vmem:[%s2765_s0 + $0x80] sm:$0xf] }
  0x18   :  { %1525 = vmatprep.subr.bf16.mxu0 %v1720_v0  ;;  %1699 = vmatprep.subr.bf16.mxu1 %v1720_v0 }
  0x1b   :  { %1526 = vmatpush3.bf16.msra.mxu0 %v1718_v26  ;;  %1707 = vmatpush3.bf16.msra.mxu1 %v1718_v26  ;;  %v41_v26 = vld [vmem:[%s2765_s0 + $0x74] sm:$0xf] }
  0x1c   :  { %1527 = vmatprep.subr.bf16.mxu0 %v1720_v0  ;;  %1700 = vmatprep.subr.bf16.mxu1 %v1720_v0  ;;  %v2024_v56 = vmax.bf16 %v1722_v14, %v41_v26  ;;  %v2078_v26 = vmax.bf16 %v1722_v14, %v43_v48  ;;  %v16_v48 = vld [vmem:[%s2765_s0 + $0x10] sm:$0xf] }
  0x1d   :  { %v97_v36 = vmax.bf16 %v1722_v14, %v16_v48  ;;  %v140_v48 = vmax.bf16 %v1722_v14, %v59_v60  ;;  %v100_v60 = vmax.bf16 %v1722_v14, %v19_v15 }
  0x1f   :  { %1528 = vmatpush3.bf16.msra.mxu0 %v1719_v43  ;;  %1708 = vmatpush3.bf16.msra.mxu1 %v1719_v43  ;;  %v42_v43 = vld [vmem:[%s2765_s0 + $0x78] sm:$0xf] }
  0x22   :  { %1530 = vmatmul.mubr.bf16.vlgmr.msra.gmra.mxu0 %v1253_v29  ;;  %1614 = vmatmul.mubr.bf16.vlgmr.msra.gmra.mxu1 %v1274_v33  ;;  %v2067_v29 = vmax.bf16 %v1722_v14, %v42_v43  ;;  %v46_v33 = vld [vmem:[%s2765_s0 + $0x88] sm:$0xf]  ;;  %v2087_v43 = vmax.bf16 %v1722_v14, %v44_v62 }
  0x23   :  { %1533 = vmatprep.mubr.msk.bf16.mxu0 %vm1721_vm0, %v1720_v0  ;;  %1617 = vmatprep.mubr.msk.bf16.mxu1 %vm1721_vm0, %v1720_v0  ;;  %v2106_v62 = vmax.bf16 %v1722_v14, %v46_v33  ;;  %v139_v33 = vmax.bf16 %v1722_v14, %v58_v16  ;;  %v60_v16 = vld [vmem:[%s2765_s0 + $0xc0] sm:$0xf] }
  0x24   :  { %v141_v20 = vmax.bf16 %v1722_v14, %v60_v16  ;;  %v2780_v53 = vcombine.low %v2067_v29, %v2078_v26  ;;  %v2782_v2 = vcombine.low %v2087_v43, %v2090_v19 }
  0x25   :  { %v1276_v49 = vcombine.low %v139_v33, %v140_v48  ;;  %v90_v33 = vld [vmem:[%s2765_s0 + $0x138] sm:$0xf]  ;;  %v99_v48 = vmax.bf16 %v1722_v14, %v18_v3 }
  0x26   :  { %v2188_v21 = vmax.bf16 %v1722_v14, %v90_v33 }
  0x2a   :  { %1534 = vmatmul.mubr.bf16.gmra.mxu0 %v1254_v39  ;;  %1618 = vmatmul.mubr.bf16.gmra.mxu1 %v1275_v40  ;;  %v2164_v39 = vmax.bf16 %v1722_v14, %v49_v22  ;;  %v1255_v40 = vcombine.low %v97_v36, %v98_v24  ;;  %v61_v36 = vld [vmem:[%s2765_s0 + $0xc4] sm:$0xf]  ;;  %v91_v24 = vld [vmem:[%s2765_s0 + $0x13c] sm:$0xf] }
  0x2b   :  { %1537 = vmatprep.mubr.msk.bf16.mxu0 %vm1721_vm0, %v1720_v0  ;;  %1621 = vmatprep.mubr.msk.bf16.mxu1 %vm1721_vm0, %v1720_v0  ;;  %v2191_v22 = vmax.bf16 %v1722_v14, %v91_v24  ;;  %v142_v27 = vmax.bf16 %v1722_v14, %v61_v36  ;;  %v1256_v36 = vcombine.low %v99_v48, %v100_v60  ;;  %v20_v24 = vld [vmem:[%s2765_s0 + $0x20] sm:$0xf]  ;;  %v63_v60 = vld [vmem:[%s2765_s0 + $0xcc] sm:$0xf] }
  0x2c   :  { %v144_v1 = vmax.bf16 %v1722_v14, %v63_v60 }
  0x2d   :  { %v1277_v33 = vcombine.low %v141_v20, %v142_v27  ;;  %v92_v27 = vld [vmem:[%s2765_s0 + $0x140] sm:$0xf]  ;;  %v101_v20 = vmax.bf16 %v1722_v14, %v20_v24 }
  0x2e   :  { %v2233_v48 = vmax.bf16 %v1722_v14, %v92_v27  ;;  %v52_v24 = vld [vmem:[%s2765_s0 + $0xa0] sm:$0xf]  ;;  %v22_v27 = vld [vmem:[%s2765_s0 + $0x28] sm:$0xf] }
  0x32   :  { %1538 = vmatmul.mubr.bf16.gmra.mxu0 %v1255_v40  ;;  %1622 = vmatmul.mubr.bf16.gmra.mxu1 %v1276_v49  ;;  %v50_v40 = vld [vmem:[%s2765_s0 + $0x98] sm:$0xf]  ;;  %v51_v49 = vld [vmem:[%s2765_s0 + $0x9c] sm:$0xf] }
  0x33   :  { %1541 = vmatprep.mubr.msk.bf16.mxu0 %vm1721_vm0, %v1720_v0  ;;  %1625 = vmatprep.mubr.msk.bf16.mxu1 %vm1721_vm0, %v1720_v0  ;;  %v2209_v15 = vmax.bf16 %v1722_v14, %v50_v40  ;;  %v2212_v16 = vmax.bf16 %v1722_v14, %v51_v49  ;;  %v62_v40 = vld [vmem:[%s2765_s0 + $0xc8] sm:$0xf]  ;;  %v102_v49 = vmax.bf16 %v1722_v14, %v21_v11 }
  0x34   :  { %v143_v3 = vmax.bf16 %v1722_v14, %v62_v40  ;;  %v2249_v11 = vmax.bf16 %v1722_v14, %v52_v24  ;;  %v64_v24 = vld [vmem:[%s2765_s0 + $0xd0] sm:$0xf] }
  0x35   :  { %v1257_v40 = vcombine.low %v101_v20, %v102_v49  ;;  %v65_v20 = vld [vmem:[%s2765_s0 + $0xd4] sm:$0xf]  ;;  %v145_v49 = vmax.bf16 %v1722_v14, %v64_v24 }
  0x36   :  { %v1278_v60 = vcombine.low %v143_v3, %v144_v1  ;;  %v103_v1 = vmax.bf16 %v1722_v14, %v22_v27  ;;  %v104_v3 = vmax.bf16 %v1722_v14, %v23_v58  ;;  %v24_v27 = vld [vmem:[%s2765_s0 + $0x30] sm:$0xf]  ;;  %v25_v58 = vld [vmem:[%s2765_s0 + $0x34] sm:$0xf] }
  0x37   :  { %v105_v24 = vmax.bf16 %v1722_v14, %v24_v27  ;;  %v26_v27 = vld [vmem:[%s2765_s0 + $0x38] sm:$0xf] }
  0x38   :  { %v1258_v63 = vcombine.low %v103_v1, %v104_v3 }
  0x3a   :  { %1542 = vmatmul.mubr.bf16.gmra.mxu0 %v1256_v36  ;;  %1626 = vmatmul.mubr.bf16.gmra.mxu1 %v1277_v33  ;;  %v53_v36 = vld [vmem:[%s2765_s0 + $0xa4] sm:$0xf] }
  0x3b   :  { %1545 = vmatprep.mubr.msk.bf16.mxu0 %vm1721_vm0, %v1720_v0  ;;  %1629 = vmatprep.mubr.msk.bf16.mxu1 %vm1721_vm0, %v1720_v0  ;;  %v2252_v33 = vmax.bf16 %v1722_v14, %v53_v36  ;;  %v146_v36 = vmax.bf16 %v1722_v14, %v65_v20  ;;  %v106_v20 = vmax.bf16 %v1722_v14, %v25_v58  ;;  %v69_v58 = vld [vmem:[%s2765_s0 + $0xe4] sm:$0xf] }
  0x3d   :  { %v1279_v57 = vcombine.low %v145_v49, %v146_v36  ;;  %v1259_v49 = vcombine.low %v105_v24, %v106_v20  ;;  %v150_v20 = vmax.bf16 %v1722_v14, %v69_v58 }
  0x42   :  { %1546 = vmatmul.mubr.bf16.gmra.mxu0 %v1257_v40  ;;  %1630 = vmatmul.mubr.bf16.gmra.mxu1 %v1278_v60  ;;  %v66_v40 = vld [vmem:[%s2765_s0 + $0xd8] sm:$0xf]  ;;  %v67_v60 = vld [vmem:[%s2765_s0 + $0xdc] sm:$0xf] }
  0x43   :  { %1549 = vmatprep.mubr.msk.bf16.mxu0 %vm1721_vm0, %v1720_v0  ;;  %1633 = vmatprep.mubr.msk.bf16.mxu1 %vm1721_vm0, %v1720_v0  ;;  %v147_v1 = vmax.bf16 %v1722_v14, %v66_v40  ;;  %v148_v3 = vmax.bf16 %v1722_v14, %v67_v60  ;;  %v107_v40 = vmax.bf16 %v1722_v14, %v26_v27 }
  0x45   :  { %v1280_v36 = vcombine.low %v147_v1, %v148_v3 }
  0x4a   :  { %1550 = vmatmul.mubr.bf16.gmra.mxu0 %v1258_v63  ;;  %1634 = vmatmul.mubr.bf16.gmra.mxu1 %v1279_v57  ;;  %v27_v57 = vld [vmem:[%s2765_s0 + $0x3c] sm:$0xf]  ;;  %v68_v63 = vld [vmem:[%s2765_s0 + $0xe0] sm:$0xf] }
  0x4b   :  { %1553 = vmatprep.mubr.msk.bf16.mxu0 %vm1721_vm0, %v1720_v0  ;;  %1637 = vmatprep.mubr.msk.bf16.mxu1 %vm1721_vm0, %v1720_v0  ;;  %v108_v60 = vmax.bf16 %v1722_v14, %v27_v57  ;;  %v149_v24 = vmax.bf16 %v1722_v14, %v68_v63  ;;  %v2767_v14 = vcombine.low %v1870_v41, %v1881_v45 }
  0x4c   :  { %v2772_v41 = vcombine.low %v1945_v4, %v1948_v5  ;;  %v2774_v45 = vcombine.low %v1968_v12, %v1971_v13  ;;  %v2783_v4 = vcombine.low %v2093_v18, %v2096_v25  ;;  %v2784_v5 = vcombine.low %v2106_v62, %v2109_v10 }
  0x4d   :  { %v1260_v1 = vcombine.low %v107_v40, %v108_v60  ;;  %v1281_v3 = vcombine.low %v149_v24, %v150_v20  ;;  %v2787_v12 = vcombine.low %v2188_v21, %v2191_v22  ;;  %v1293_v13 = vcombine.low %v2233_v48, %v2233_v48 }
  0x52   :  { %1554 = vmatmul.mubr.bf16.gmra.mxu0 %v1259_v49  ;;  %1638 = vmatmul.mubr.bf16.gmra.mxu1 %v1280_v36  ;;  %v2768_v49 = vcombine.low %v1884_v46, %v1887_v47  ;;  %v2769_v36 = vcombine.low %v1896_v50, %v1899_v51  ;;  %v2775_v46 = vcombine.low %v1974_v17, %v1990_v30 }
  0x53   :  { %1557 = vmatprep.mubr.msk.bf16.mxu0 %vm1721_vm0, %v1720_v0  ;;  %1641 = vmatprep.mubr.msk.bf16.mxu1 %vm1721_vm0, %v1720_v0  ;;  %v2776_v47 = vcombine.low %v2001_v37, %v2004_v38  ;;  %v2777_v50 = vcombine.low %v2007_v42, %v2018_v54  ;;  %v2778_v51 = vcombine.low %v2021_v55, %v2024_v56 }
  0x54   :  { %v2788_v17 = vcombine.low %v2209_v15, %v2212_v16 }
  0x5a   :  { %1558 = vmatmul.mubr.bf16.gmra.mxu0 %v1260_v1  ;;  %1642 = vmatmul.mubr.bf16.gmra.mxu1 %v1281_v3 }
  0x5b   :  { %1561 = vmatprep.mubr.msk.bf16.mxu0 %vm1721_vm0, %v1720_v0  ;;  %1645 = vmatprep.mubr.msk.bf16.mxu1 %vm1721_vm0, %v1720_v0 }
  0x62   :  { %1562 = vmatmul.mubr.bf16.gmra.mxu0 %v1261_v44  ;;  %1646 = vmatmul.mubr.bf16.gmra.mxu1 %v2767_v14  ;;  %v2773_v44 = vcombine.low %v1951_v6, %v1954_v7  ;;  %v2785_v6 = vcombine.low %v2134_v28, %v2137_v61  ;;  %v2786_v7 = vcombine.low %v2161_v23, %v2164_v39 }
  0x63   :  { %1565 = vmatprep.mubr.msk.bf16.mxu0 %vm1721_vm0, %v1720_v0  ;;  %1649 = vmatprep.mubr.msk.bf16.mxu1 %vm1721_vm0, %v1720_v0  ;;  %v2789_v28 = vcombine.low %v2249_v11, %v2252_v33 }
  0x6a   :  { %1566 = vmatmul.mubr.bf16.gmra.mxu0 %v2768_v49  ;;  %1650 = vmatmul.mubr.bf16.gmra.mxu1 %v2769_v36 }
  0x6b   :  { %1569 = vmatprep.mubr.msk.bf16.mxu0 %vm1721_vm0, %v1720_v0  ;;  %1653 = vmatprep.mubr.msk.bf16.mxu1 %vm1721_vm0, %v1720_v0 }
  0x72   :  { %1570 = vmatmul.mubr.bf16.gmra.mxu0 %v2770_v34  ;;  %1654 = vmatmul.mubr.bf16.gmra.mxu1 %v2771_v35 }
  0x73   :  { %1573 = vmatprep.mubr.msk.bf16.mxu0 %vm1721_vm0, %v1720_v0  ;;  %1657 = vmatprep.mubr.msk.bf16.mxu1 %vm1721_vm0, %v1720_v0 }
  0x7a   :  { %1574 = vmatmul.mubr.bf16.gmra.mxu0 %v2772_v41  ;;  %1658 = vmatmul.mubr.bf16.gmra.mxu1 %v2773_v44 }
  0x7b   :  { %1577 = vmatprep.mubr.msk.bf16.mxu0 %vm1721_vm0, %v1720_v0  ;;  %1661 = vmatprep.mubr.msk.bf16.mxu1 %vm1721_vm0, %v1720_v0 }
  0x82   :  { %1578 = vmatmul.mubr.bf16.gmra.mxu0 %v2774_v45  ;;  %1662 = vmatmul.mubr.bf16.gmra.mxu1 %v2775_v46 }
  0x83   :  { %1581 = vmatprep.mubr.msk.bf16.mxu0 %vm1721_vm0, %v1720_v0  ;;  %1665 = vmatprep.mubr.msk.bf16.mxu1 %vm1721_vm0, %v1720_v0 }
  0x8a   :  { %1582 = vmatmul.mubr.bf16.gmra.mxu0 %v2776_v47  ;;  %1666 = vmatmul.mubr.bf16.gmra.mxu1 %v2777_v50 }
  0x8b   :  { %1585 = vmatprep.mubr.msk.bf16.mxu0 %vm1721_vm0, %v1720_v0  ;;  %1669 = vmatprep.mubr.msk.bf16.mxu1 %vm1721_vm0, %v1720_v0 }
  0x92   :  { %1586 = vmatmul.mubr.bf16.gmra.mxu0 %v2778_v51  ;;  %1670 = vmatmul.mubr.bf16.gmra.mxu1 %v2779_v52 }
  0x93   :  { %1589 = vmatprep.mubr.msk.bf16.mxu0 %vm1721_vm0, %v1720_v0  ;;  %1673 = vmatprep.mubr.msk.bf16.mxu1 %vm1721_vm0, %v1720_v0 }
  0x9a   :  { %1590 = vmatmul.mubr.bf16.gmra.mxu0 %v2780_v53  ;;  %1674 = vmatmul.mubr.bf16.gmra.mxu1 %v2781_v59 }
  0x9b   :  { %1593 = vmatprep.mubr.msk.bf16.mxu0 %vm1721_vm0, %v1720_v0  ;;  %1677 = vmatprep.mubr.msk.bf16.mxu1 %vm1721_vm0, %v1720_v0 }
  0xa2   :  { %1594 = vmatmul.mubr.bf16.gmra.mxu0 %v2782_v2  ;;  %1678 = vmatmul.mubr.bf16.gmra.mxu1 %v2783_v4 }
  0xa3   :  { %1597 = vmatprep.mubr.msk.bf16.mxu0 %vm1721_vm0, %v1720_v0  ;;  %1681 = vmatprep.mubr.msk.bf16.mxu1 %vm1721_vm0, %v1720_v0 }
  0xaa   :  { %1598 = vmatmul.mubr.bf16.gmra.mxu0 %v2784_v5  ;;  %1682 = vmatmul.mubr.bf16.gmra.mxu1 %v2785_v6 }
  0xab   :  { %1601 = vmatprep.mubr.msk.bf16.mxu0 %vm1721_vm0, %v1720_v0  ;;  %1685 = vmatprep.mubr.msk.bf16.mxu1 %vm1721_vm0, %v1720_v0 }
  0xb2   :  { %1602 = vmatmul.mubr.bf16.gmra.mxu0 %v2786_v7  ;;  %1686 = vmatmul.mubr.bf16.gmra.mxu1 %v2787_v12 }
  0xb3   :  { %1605 = vmatprep.mubr.msk.bf16.mxu0 %vm1721_vm0, %v1720_v0  ;;  %1689 = vmatprep.mubr.msk.bf16.mxu1 %vm1721_vm0, %v1720_v0 }
  0xba   :  { %1606 = vmatmul.mubr.bf16.gmra.mxu0 %v2788_v17  ;;  %1690 = vmatmul.mubr.bf16.gmra.mxu1 %v1293_v13 }
  0xbb   :  { %1609 = vmatprep.mubr.msk.bf16.mxu0 %vm1721_vm0, %v1720_v0 }
  0xc2   :  { %1610 = vmatmul.mubr.bf16.gmra.mxu0 %v2789_v28 }
  0xe2   :  { %v516_v30 = vpop.f32.mrf.mxu0  ;;  %v684_v37 = vpop.f32.mrf.mxu1 }
  0xe3   :  { %v1383_v38 = vpack.c.bf16 %v516_v30, %v516_v30  ;;  %v1425_v42 = vpack.c.bf16 %v684_v37, %v684_v37 }
  0xe4   :  { %v1531_v54 = vpop.f32.mrf.mxu0  ;;  %v1615_v55 = vpop.f32.mrf.mxu1 }
  0xe5   :  { %1168 = vst.msk [vmem:[%s2766_s2] sm:$0xf] %vm1167_vm1, %v1383_v38  ;;  %1210 = vst.msk [vmem:[%s2766_s2 + $0xa8] sm:$0xf] %vm1167_vm1, %v1425_v42 }
  0xe6   :  { %v519_v0 = vpop.f32.mrf.mxu0  ;;  %v687_v56 = vpop.f32.mrf.mxu1 }
  0xe7   :  { %v1384_v8 = vpack.c.bf16 %v519_v0, %v519_v0  ;;  %v1426_v9 = vpack.c.bf16 %v687_v56, %v687_v56 }
  0xe8   :  { %v1532_v18 = vpop.f32.mrf.mxu0  ;;  %v1616_v19 = vpop.f32.mrf.mxu1 }
  0xe9   :  { %1169 = vst.msk [vmem:[%s2766_s2 + $0x4] sm:$0xf] %vm1167_vm1, %v1384_v8  ;;  %1211 = vst.msk [vmem:[%s2766_s2 + $0xac] sm:$0xf] %vm1167_vm1, %v1426_v9 }
  0xea   :  { %v524_v29 = vpop.f32.mrf.mxu0  ;;  %v692_v25 = vpop.f32.mrf.mxu1 }
  0xeb   :  { %v1385_v26 = vpack.c.bf16 %v524_v29, %v524_v29  ;;  %v1427_v31 = vpack.c.bf16 %v692_v25, %v692_v25 }
  0xec   :  { %v1535_v32 = vpop.f32.mrf.mxu0  ;;  %v1619_v43 = vpop.f32.mrf.mxu1 }
  0xed   :  { %1170 = vst.msk [vmem:[%s2766_s2 + $0x8] sm:$0xf] %vm1167_vm1, %v1385_v26  ;;  %1212 = vst.msk [vmem:[%s2766_s2 + $0xb0] sm:$0xf] %vm1167_vm1, %v1427_v31 }
  0xee   :  { %v527_v61 = vpop.f32.mrf.mxu0  ;;  %v695_v62 = vpop.f32.mrf.mxu1 }
  0xef   :  { %v1386_v10 = vpack.c.bf16 %v527_v61, %v527_v61  ;;  %v1428_v23 = vpack.c.bf16 %v695_v62, %v695_v62 }
  0xf0   :  { %v1536_v39 = vpop.f32.mrf.mxu0  ;;  %v1620_v21 = vpop.f32.mrf.mxu1 }
  0xf1   :  { %1171 = vst.msk [vmem:[%s2766_s2 + $0xc] sm:$0xf] %vm1167_vm1, %v1386_v10  ;;  %1213 = vst.msk [vmem:[%s2766_s2 + $0xb4] sm:$0xf] %vm1167_vm1, %v1428_v23 }
  0xf2   :  { %v532_v22 = vpop.f32.mrf.mxu0  ;;  %v700_v15 = vpop.f32.mrf.mxu1 }
  0xf3   :  { %v1387_v16 = vpack.c.bf16 %v532_v22, %v532_v22  ;;  %v1429_v48 = vpack.c.bf16 %v700_v15, %v700_v15 }
  0xf4   :  { %v1539_v11 = vpop.f32.mrf.mxu0  ;;  %v1623_v33 = vpop.f32.mrf.mxu1 }
  0xf5   :  { %1172 = vst.msk [vmem:[%s2766_s2 + $0x10] sm:$0xf] %vm1167_vm1, %v1387_v16  ;;  %1214 = vst.msk [vmem:[%s2766_s2 + $0xb8] sm:$0xf] %vm1167_vm1, %v1429_v48 }
  0xf6   :  { %v535_v27 = vpop.f32.mrf.mxu0  ;;  %v703_v57 = vpop.f32.mrf.mxu1 }
  0xf7   :  { %v1388_v63 = vpack.c.bf16 %v535_v27, %v535_v27  ;;  %v1430_v58 = vpack.c.bf16 %v703_v57, %v703_v57 }
  0xf8   :  { %v1540_v40 = vpop.f32.mrf.mxu0  ;;  %v1624_v60 = vpop.f32.mrf.mxu1 }
  0xf9   :  { %1173 = vst.msk [vmem:[%s2766_s2 + $0x14] sm:$0xf] %vm1167_vm1, %v1388_v63  ;;  %1215 = vst.msk [vmem:[%s2766_s2 + $0xbc] sm:$0xf] %vm1167_vm1, %v1430_v58 }
  0xfa   :  { %v540_v24 = vpop.f32.mrf.mxu0  ;;  %v708_v20 = vpop.f32.mrf.mxu1 }
  0xfb   :  { %v1389_v1 = vpack.c.bf16 %v540_v24, %v540_v24  ;;  %v1431_v3 = vpack.c.bf16 %v708_v20, %v708_v20 }
  0xfc   :  { %v1543_v14 = vpop.f32.mrf.mxu0  ;;  %v1627_v49 = vpop.f32.mrf.mxu1 }
  0xfd   :  { %1174 = vst.msk [vmem:[%s2766_s2 + $0x18] sm:$0xf] %vm1167_vm1, %v1389_v1  ;;  %1216 = vst.msk [vmem:[%s2766_s2 + $0xc0] sm:$0xf] %vm1167_vm1, %v1431_v3 }
  0xfe   :  { %v543_v36 = vpop.f32.mrf.mxu0  ;;  %v711_v34 = vpop.f32.mrf.mxu1 }
  0xff   :  { %v1390_v35 = vpack.c.bf16 %v543_v36, %v543_v36  ;;  %v1432_v41 = vpack.c.bf16 %v711_v34, %v711_v34 }
 0x100   :  { %v1544_v44 = vpop.f32.mrf.mxu0  ;;  %v1628_v45 = vpop.f32.mrf.mxu1 }
 0x101   :  { %1175 = vst.msk [vmem:[%s2766_s2 + $0x1c] sm:$0xf] %vm1167_vm1, %v1390_v35  ;;  %1217 = vst.msk [vmem:[%s2766_s2 + $0xc4] sm:$0xf] %vm1167_vm1, %v1432_v41 }
 0x102   :  { %v548_v46 = vpop.f32.mrf.mxu0  ;;  %v716_v47 = vpop.f32.mrf.mxu1 }
 0x103   :  { %v1391_v50 = vpack.c.bf16 %v548_v46, %v548_v46  ;;  %v1433_v51 = vpack.c.bf16 %v716_v47, %v716_v47 }
 0x104   :  { %v1547_v52 = vpop.f32.mrf.mxu0  ;;  %v1631_v53 = vpop.f32.mrf.mxu1 }
 0x105   :  { %1176 = vst.msk [vmem:[%s2766_s2 + $0x20] sm:$0xf] %vm1167_vm1, %v1391_v50  ;;  %1218 = vst.msk [vmem:[%s2766_s2 + $0xc8] sm:$0xf] %vm1167_vm1, %v1433_v51 }
 0x106   :  { %v551_v59 = vpop.f32.mrf.mxu0  ;;  %v719_v2 = vpop.f32.mrf.mxu1 }
 0x107   :  { %v1392_v4 = vpack.c.bf16 %v551_v59, %v551_v59  ;;  %v1434_v5 = vpack.c.bf16 %v719_v2, %v719_v2 }
 0x108   :  { %v1548_v6 = vpop.f32.mrf.mxu0  ;;  %v1632_v7 = vpop.f32.mrf.mxu1 }
 0x109   :  { %1177 = vst.msk [vmem:[%s2766_s2 + $0x24] sm:$0xf] %vm1167_vm1, %v1392_v4  ;;  %1219 = vst.msk [vmem:[%s2766_s2 + $0xcc] sm:$0xf] %vm1167_vm1, %v1434_v5 }
 0x10a   :  { %v556_v12 = vpop.f32.mrf.mxu0  ;;  %v724_v13 = vpop.f32.mrf.mxu1 }
 0x10b   :  { %v1393_v17 = vpack.c.bf16 %v556_v12, %v556_v12  ;;  %v1435_v28 = vpack.c.bf16 %v724_v13, %v724_v13 }
 0x10c   :  { %v1551_v30 = vpop.f32.mrf.mxu0  ;;  %v1635_v37 = vpop.f32.mrf.mxu1 }
 0x10d   :  { %1178 = vst.msk [vmem:[%s2766_s2 + $0x28] sm:$0xf] %vm1167_vm1, %v1393_v17  ;;  %1220 = vst.msk [vmem:[%s2766_s2 + $0xd0] sm:$0xf] %vm1167_vm1, %v1435_v28 }
 0x10e   :  { %v559_v38 = vpop.f32.mrf.mxu0  ;;  %v727_v42 = vpop.f32.mrf.mxu1 }
 0x10f   :  { %v1394_v54 = vpack.c.bf16 %v559_v38, %v559_v38  ;;  %v1436_v55 = vpack.c.bf16 %v727_v42, %v727_v42 }
 0x110   :  { %v1552_v0 = vpop.f32.mrf.mxu0  ;;  %v1636_v56 = vpop.f32.mrf.mxu1 }
 0x111   :  { %1179 = vst.msk [vmem:[%s2766_s2 + $0x2c] sm:$0xf] %vm1167_vm1, %v1394_v54  ;;  %1221 = vst.msk [vmem:[%s2766_s2 + $0xd4] sm:$0xf] %vm1167_vm1, %v1436_v55 }
 0x112   :  { %v564_v8 = vpop.f32.mrf.mxu0  ;;  %v732_v9 = vpop.f32.mrf.mxu1 }
 0x113   :  { %v1395_v18 = vpack.c.bf16 %v564_v8, %v564_v8  ;;  %v1437_v19 = vpack.c.bf16 %v732_v9, %v732_v9 }
 0x114   :  { %v1555_v29 = vpop.f32.mrf.mxu0  ;;  %v1639_v25 = vpop.f32.mrf.mxu1 }
 0x115   :  { %1180 = vst.msk [vmem:[%s2766_s2 + $0x30] sm:$0xf] %vm1167_vm1, %v1395_v18  ;;  %1222 = vst.msk [vmem:[%s2766_s2 + $0xd8] sm:$0xf] %vm1167_vm1, %v1437_v19 }
 0x116   :  { %v567_v26 = vpop.f32.mrf.mxu0  ;;  %v735_v31 = vpop.f32.mrf.mxu1 }
 0x117   :  { %v1396_v32 = vpack.c.bf16 %v567_v26, %v567_v26  ;;  %v1438_v43 = vpack.c.bf16 %v735_v31, %v735_v31 }
 0x118   :  { %v1556_v61 = vpop.f32.mrf.mxu0  ;;  %v1640_v62 = vpop.f32.mrf.mxu1 }
 0x119   :  { %1181 = vst.msk [vmem:[%s2766_s2 + $0x34] sm:$0xf] %vm1167_vm1, %v1396_v32  ;;  %1223 = vst.msk [vmem:[%s2766_s2 + $0xdc] sm:$0xf] %vm1167_vm1, %v1438_v43 }
 0x11a   :  { %v572_v10 = vpop.f32.mrf.mxu0  ;;  %v740_v23 = vpop.f32.mrf.mxu1 }
 0x11b   :  { %v1397_v39 = vpack.c.bf16 %v572_v10, %v572_v10  ;;  %v1439_v21 = vpack.c.bf16 %v740_v23, %v740_v23 }
 0x11c   :  { %v1559_v22 = vpop.f32.mrf.mxu0  ;;  %v1643_v15 = vpop.f32.mrf.mxu1 }
 0x11d   :  { %1182 = vst.msk [vmem:[%s2766_s2 + $0x38] sm:$0xf] %vm1167_vm1, %v1397_v39  ;;  %1224 = vst.msk [vmem:[%s2766_s2 + $0xe0] sm:$0xf] %vm1167_vm1, %v1439_v21 }
 0x11e   :  { %v575_v16 = vpop.f32.mrf.mxu0  ;;  %v743_v48 = vpop.f32.mrf.mxu1 }
 0x11f   :  { %v1398_v11 = vpack.c.bf16 %v575_v16, %v575_v16  ;;  %v1440_v33 = vpack.c.bf16 %v743_v48, %v743_v48 }
 0x120   :  { %v1560_v27 = vpop.f32.mrf.mxu0  ;;  %v1644_v57 = vpop.f32.mrf.mxu1 }
 0x121   :  { %1183 = vst.msk [vmem:[%s2766_s2 + $0x3c] sm:$0xf] %vm1167_vm1, %v1398_v11  ;;  %1225 = vst.msk [vmem:[%s2766_s2 + $0xe4] sm:$0xf] %vm1167_vm1, %v1440_v33 }
 0x122   :  { %v580_v63 = vpop.f32.mrf.mxu0  ;;  %v748_v58 = vpop.f32.mrf.mxu1 }
 0x123   :  { %v1399_v40 = vpack.c.bf16 %v580_v63, %v580_v63  ;;  %v1441_v60 = vpack.c.bf16 %v748_v58, %v748_v58 }
 0x124   :  { %v1563_v24 = vpop.f32.mrf.mxu0  ;;  %v1647_v20 = vpop.f32.mrf.mxu1 }
 0x125   :  { %1184 = vst.msk [vmem:[%s2766_s2 + $0x40] sm:$0xf] %vm1167_vm1, %v1399_v40  ;;  %1226 = vst.msk [vmem:[%s2766_s2 + $0xe8] sm:$0xf] %vm1167_vm1, %v1441_v60 }
 0x126   :  { %v583_v1 = vpop.f32.mrf.mxu0  ;;  %v751_v3 = vpop.f32.mrf.mxu1 }
 0x127   :  { %v1400_v14 = vpack.c.bf16 %v583_v1, %v583_v1  ;;  %v1442_v49 = vpack.c.bf16 %v751_v3, %v751_v3 }
 0x128   :  { %v1564_v36 = vpop.f32.mrf.mxu0  ;;  %v1648_v34 = vpop.f32.mrf.mxu1 }
 0x129   :  { %1185 = vst.msk [vmem:[%s2766_s2 + $0x44] sm:$0xf] %vm1167_vm1, %v1400_v14  ;;  %1227 = vst.msk [vmem:[%s2766_s2 + $0xec] sm:$0xf] %vm1167_vm1, %v1442_v49 }
 0x12a   :  { %v588_v35 = vpop.f32.mrf.mxu0  ;;  %v756_v41 = vpop.f32.mrf.mxu1 }
 0x12b   :  { %v1401_v44 = vpack.c.bf16 %v588_v35, %v588_v35  ;;  %v1443_v45 = vpack.c.bf16 %v756_v41, %v756_v41 }
 0x12c   :  { %v1567_v46 = vpop.f32.mrf.mxu0  ;;  %v1651_v47 = vpop.f32.mrf.mxu1 }
 0x12d   :  { %1186 = vst.msk [vmem:[%s2766_s2 + $0x48] sm:$0xf] %vm1167_vm1, %v1401_v44  ;;  %1228 = vst.msk [vmem:[%s2766_s2 + $0xf0] sm:$0xf] %vm1167_vm1, %v1443_v45 }
 0x12e   :  { %v591_v50 = vpop.f32.mrf.mxu0  ;;  %v759_v51 = vpop.f32.mrf.mxu1 }
 0x12f   :  { %v1402_v52 = vpack.c.bf16 %v591_v50, %v591_v50  ;;  %v1444_v53 = vpack.c.bf16 %v759_v51, %v759_v51 }
 0x130   :  { %v1568_v59 = vpop.f32.mrf.mxu0  ;;  %v1652_v2 = vpop.f32.mrf.mxu1 }
 0x131   :  { %1187 = vst.msk [vmem:[%s2766_s2 + $0x4c] sm:$0xf] %vm1167_vm1, %v1402_v52  ;;  %1229 = vst.msk [vmem:[%s2766_s2 + $0xf4] sm:$0xf] %vm1167_vm1, %v1444_v53 }
 0x132   :  { %v596_v4 = vpop.f32.mrf.mxu0  ;;  %v764_v5 = vpop.f32.mrf.mxu1 }
 0x133   :  { %v1403_v6 = vpack.c.bf16 %v596_v4, %v596_v4  ;;  %v1445_v7 = vpack.c.bf16 %v764_v5, %v764_v5 }
 0x134   :  { %v1571_v12 = vpop.f32.mrf.mxu0  ;;  %v1655_v13 = vpop.f32.mrf.mxu1 }
 0x135   :  { %1188 = vst.msk [vmem:[%s2766_s2 + $0x50] sm:$0xf] %vm1167_vm1, %v1403_v6  ;;  %1230 = vst.msk [vmem:[%s2766_s2 + $0xf8] sm:$0xf] %vm1167_vm1, %v1445_v7 }
 0x136   :  { %v599_v17 = vpop.f32.mrf.mxu0  ;;  %v767_v28 = vpop.f32.mrf.mxu1 }
 0x137   :  { %v1404_v30 = vpack.c.bf16 %v599_v17, %v599_v17  ;;  %v1446_v37 = vpack.c.bf16 %v767_v28, %v767_v28 }
 0x138   :  { %v1572_v38 = vpop.f32.mrf.mxu0  ;;  %v1656_v42 = vpop.f32.mrf.mxu1 }
 0x139   :  { %1189 = vst.msk [vmem:[%s2766_s2 + $0x54] sm:$0xf] %vm1167_vm1, %v1404_v30  ;;  %1231 = vst.msk [vmem:[%s2766_s2 + $0xfc] sm:$0xf] %vm1167_vm1, %v1446_v37 }
 0x13a   :  { %v604_v54 = vpop.f32.mrf.mxu0  ;;  %v772_v55 = vpop.f32.mrf.mxu1 }
 0x13b   :  { %v1405_v0 = vpack.c.bf16 %v604_v54, %v604_v54  ;;  %v1447_v56 = vpack.c.bf16 %v772_v55, %v772_v55 }
 0x13c   :  { %v1575_v8 = vpop.f32.mrf.mxu0  ;;  %v1659_v9 = vpop.f32.mrf.mxu1 }
 0x13d   :  { %1190 = vst.msk [vmem:[%s2766_s2 + $0x58] sm:$0xf] %vm1167_vm1, %v1405_v0  ;;  %1232 = vst.msk [vmem:[%s2766_s2 + $0x100] sm:$0xf] %vm1167_vm1, %v1447_v56 }
 0x13e   :  { %v607_v18 = vpop.f32.mrf.mxu0  ;;  %v775_v19 = vpop.f32.mrf.mxu1 }
 0x13f   :  { %v1406_v29 = vpack.c.bf16 %v607_v18, %v607_v18  ;;  %v1448_v25 = vpack.c.bf16 %v775_v19, %v775_v19 }
 0x140   :  { %v1576_v26 = vpop.f32.mrf.mxu0  ;;  %v1660_v31 = vpop.f32.mrf.mxu1 }
 0x141   :  { %1191 = vst.msk [vmem:[%s2766_s2 + $0x5c] sm:$0xf] %vm1167_vm1, %v1406_v29  ;;  %1233 = vst.msk [vmem:[%s2766_s2 + $0x104] sm:$0xf] %vm1167_vm1, %v1448_v25 }
 0x142   :  { %v612_v32 = vpop.f32.mrf.mxu0  ;;  %v780_v43 = vpop.f32.mrf.mxu1 }
 0x143   :  { %v1407_v61 = vpack.c.bf16 %v612_v32, %v612_v32  ;;  %v1449_v62 = vpack.c.bf16 %v780_v43, %v780_v43 }
 0x144   :  { %v1579_v10 = vpop.f32.mrf.mxu0  ;;  %v1663_v23 = vpop.f32.mrf.mxu1 }
 0x145   :  { %1192 = vst.msk [vmem:[%s2766_s2 + $0x60] sm:$0xf] %vm1167_vm1, %v1407_v61  ;;  %1234 = vst.msk [vmem:[%s2766_s2 + $0x108] sm:$0xf] %vm1167_vm1, %v1449_v62 }
 0x146   :  { %v615_v39 = vpop.f32.mrf.mxu0  ;;  %v783_v21 = vpop.f32.mrf.mxu1 }
 0x147   :  { %v1408_v22 = vpack.c.bf16 %v615_v39, %v615_v39  ;;  %v1450_v15 = vpack.c.bf16 %v783_v21, %v783_v21 }
 0x148   :  { %v1580_v16 = vpop.f32.mrf.mxu0  ;;  %v1664_v48 = vpop.f32.mrf.mxu1 }
 0x149   :  { %1193 = vst.msk [vmem:[%s2766_s2 + $0x64] sm:$0xf] %vm1167_vm1, %v1408_v22  ;;  %1235 = vst.msk [vmem:[%s2766_s2 + $0x10c] sm:$0xf] %vm1167_vm1, %v1450_v15 }
 0x14a   :  { %v620_v11 = vpop.f32.mrf.mxu0  ;;  %v788_v33 = vpop.f32.mrf.mxu1 }
 0x14b   :  { %v1409_v27 = vpack.c.bf16 %v620_v11, %v620_v11  ;;  %v1451_v57 = vpack.c.bf16 %v788_v33, %v788_v33 }
 0x14c   :  { %v1583_v63 = vpop.f32.mrf.mxu0  ;;  %v1667_v58 = vpop.f32.mrf.mxu1 }
 0x14d   :  { %1194 = vst.msk [vmem:[%s2766_s2 + $0x68] sm:$0xf] %vm1167_vm1, %v1409_v27  ;;  %1236 = vst.msk [vmem:[%s2766_s2 + $0x110] sm:$0xf] %vm1167_vm1, %v1451_v57 }
 0x14e   :  { %v623_v40 = vpop.f32.mrf.mxu0  ;;  %v791_v60 = vpop.f32.mrf.mxu1 }
 0x14f   :  { %v1410_v24 = vpack.c.bf16 %v623_v40, %v623_v40  ;;  %v1452_v20 = vpack.c.bf16 %v791_v60, %v791_v60 }
 0x150   :  { %v1584_v1 = vpop.f32.mrf.mxu0  ;;  %v1668_v3 = vpop.f32.mrf.mxu1 }
 0x151   :  { %1195 = vst.msk [vmem:[%s2766_s2 + $0x6c] sm:$0xf] %vm1167_vm1, %v1410_v24  ;;  %1237 = vst.msk [vmem:[%s2766_s2 + $0x114] sm:$0xf] %vm1167_vm1, %v1452_v20 }
 0x152   :  { %v628_v14 = vpop.f32.mrf.mxu0  ;;  %v796_v49 = vpop.f32.mrf.mxu1 }
 0x153   :  { %v1411_v36 = vpack.c.bf16 %v628_v14, %v628_v14  ;;  %v1453_v34 = vpack.c.bf16 %v796_v49, %v796_v49 }
 0x154   :  { %v1587_v35 = vpop.f32.mrf.mxu0  ;;  %v1671_v41 = vpop.f32.mrf.mxu1 }
 0x155   :  { %1196 = vst.msk [vmem:[%s2766_s2 + $0x70] sm:$0xf] %vm1167_vm1, %v1411_v36  ;;  %1238 = vst.msk [vmem:[%s2766_s2 + $0x118] sm:$0xf] %vm1167_vm1, %v1453_v34 }
 0x156   :  { %v631_v44 = vpop.f32.mrf.mxu0  ;;  %v799_v45 = vpop.f32.mrf.mxu1 }
 0x157   :  { %v1412_v46 = vpack.c.bf16 %v631_v44, %v631_v44  ;;  %v1454_v47 = vpack.c.bf16 %v799_v45, %v799_v45 }
 0x158   :  { %v1588_v50 = vpop.f32.mrf.mxu0  ;;  %v1672_v51 = vpop.f32.mrf.mxu1 }
 0x159   :  { %1197 = vst.msk [vmem:[%s2766_s2 + $0x74] sm:$0xf] %vm1167_vm1, %v1412_v46  ;;  %1239 = vst.msk [vmem:[%s2766_s2 + $0x11c] sm:$0xf] %vm1167_vm1, %v1454_v47 }
 0x15a   :  { %v636_v52 = vpop.f32.mrf.mxu0  ;;  %v804_v53 = vpop.f32.mrf.mxu1 }
 0x15b   :  { %v1413_v59 = vpack.c.bf16 %v636_v52, %v636_v52  ;;  %v1455_v2 = vpack.c.bf16 %v804_v53, %v804_v53 }
 0x15c   :  { %v1591_v4 = vpop.f32.mrf.mxu0  ;;  %v1675_v5 = vpop.f32.mrf.mxu1 }
 0x15d   :  { %1198 = vst.msk [vmem:[%s2766_s2 + $0x78] sm:$0xf] %vm1167_vm1, %v1413_v59  ;;  %1240 = vst.msk [vmem:[%s2766_s2 + $0x120] sm:$0xf] %vm1167_vm1, %v1455_v2 }
 0x15e   :  { %v639_v6 = vpop.f32.mrf.mxu0  ;;  %v807_v7 = vpop.f32.mrf.mxu1 }
 0x15f   :  { %v1414_v12 = vpack.c.bf16 %v639_v6, %v639_v6  ;;  %v1456_v13 = vpack.c.bf16 %v807_v7, %v807_v7 }
 0x160   :  { %v1592_v17 = vpop.f32.mrf.mxu0  ;;  %v1676_v28 = vpop.f32.mrf.mxu1 }
 0x161   :  { %1199 = vst.msk [vmem:[%s2766_s2 + $0x7c] sm:$0xf] %vm1167_vm1, %v1414_v12  ;;  %1241 = vst.msk [vmem:[%s2766_s2 + $0x124] sm:$0xf] %vm1167_vm1, %v1456_v13 }
 0x162   :  { %v644_v30 = vpop.f32.mrf.mxu0  ;;  %v812_v37 = vpop.f32.mrf.mxu1 }
 0x163   :  { %v1415_v38 = vpack.c.bf16 %v644_v30, %v644_v30  ;;  %v1457_v42 = vpack.c.bf16 %v812_v37, %v812_v37 }
 0x164   :  { %v1595_v54 = vpop.f32.mrf.mxu0  ;;  %v1679_v55 = vpop.f32.mrf.mxu1 }
 0x165   :  { %1200 = vst.msk [vmem:[%s2766_s2 + $0x80] sm:$0xf] %vm1167_vm1, %v1415_v38  ;;  %1242 = vst.msk [vmem:[%s2766_s2 + $0x128] sm:$0xf] %vm1167_vm1, %v1457_v42 }
 0x166   :  { %v647_v0 = vpop.f32.mrf.mxu0  ;;  %v815_v56 = vpop.f32.mrf.mxu1 }
 0x167   :  { %v1416_v8 = vpack.c.bf16 %v647_v0, %v647_v0  ;;  %v1458_v9 = vpack.c.bf16 %v815_v56, %v815_v56 }
 0x168   :  { %v1596_v18 = vpop.f32.mrf.mxu0  ;;  %v1680_v19 = vpop.f32.mrf.mxu1 }
 0x169   :  { %1201 = vst.msk [vmem:[%s2766_s2 + $0x84] sm:$0xf] %vm1167_vm1, %v1416_v8  ;;  %1243 = vst.msk [vmem:[%s2766_s2 + $0x12c] sm:$0xf] %vm1167_vm1, %v1458_v9 }
 0x16a   :  { %v652_v29 = vpop.f32.mrf.mxu0  ;;  %v820_v25 = vpop.f32.mrf.mxu1 }
 0x16b   :  { %v1417_v26 = vpack.c.bf16 %v652_v29, %v652_v29  ;;  %v1459_v31 = vpack.c.bf16 %v820_v25, %v820_v25 }
 0x16c   :  { %v1599_v32 = vpop.f32.mrf.mxu0  ;;  %v1683_v43 = vpop.f32.mrf.mxu1 }
 0x16d   :  { %1202 = vst.msk [vmem:[%s2766_s2 + $0x88] sm:$0xf] %vm1167_vm1, %v1417_v26  ;;  %1244 = vst.msk [vmem:[%s2766_s2 + $0x130] sm:$0xf] %vm1167_vm1, %v1459_v31 }
 0x16e   :  { %v655_v61 = vpop.f32.mrf.mxu0  ;;  %v823_v62 = vpop.f32.mrf.mxu1 }
 0x16f   :  { %v1418_v10 = vpack.c.bf16 %v655_v61, %v655_v61  ;;  %v1460_v23 = vpack.c.bf16 %v823_v62, %v823_v62 }
 0x170   :  { %v1600_v39 = vpop.f32.mrf.mxu0  ;;  %v1684_v21 = vpop.f32.mrf.mxu1 }
 0x171   :  { %1203 = vst.msk [vmem:[%s2766_s2 + $0x8c] sm:$0xf] %vm1167_vm1, %v1418_v10  ;;  %1245 = vst.msk [vmem:[%s2766_s2 + $0x134] sm:$0xf] %vm1167_vm1, %v1460_v23 }
 0x172   :  { %v660_v22 = vpop.f32.mrf.mxu0  ;;  %v828_v15 = vpop.f32.mrf.mxu1 }
 0x173   :  { %v1419_v16 = vpack.c.bf16 %v660_v22, %v660_v22  ;;  %v1461_v48 = vpack.c.bf16 %v828_v15, %v828_v15 }
 0x174   :  { %v1603_v11 = vpop.f32.mrf.mxu0  ;;  %v1687_v33 = vpop.f32.mrf.mxu1 }
 0x175   :  { %1204 = vst.msk [vmem:[%s2766_s2 + $0x90] sm:$0xf] %vm1167_vm1, %v1419_v16  ;;  %1246 = vst.msk [vmem:[%s2766_s2 + $0x138] sm:$0xf] %vm1167_vm1, %v1461_v48 }
 0x176   :  { %v663_v27 = vpop.f32.mrf.mxu0  ;;  %v831_v57 = vpop.f32.mrf.mxu1 }
 0x177   :  { %v1420_v63 = vpack.c.bf16 %v663_v27, %v663_v27  ;;  %v1462_v58 = vpack.c.bf16 %v831_v57, %v831_v57 }
 0x178   :  { %v1604_v40 = vpop.f32.mrf.mxu0  ;;  %v1688_v60 = vpop.f32.mrf.mxu1 }
 0x179   :  { %1205 = vst.msk [vmem:[%s2766_s2 + $0x94] sm:$0xf] %vm1167_vm1, %v1420_v63  ;;  %1247 = vst.msk [vmem:[%s2766_s2 + $0x13c] sm:$0xf] %vm1167_vm1, %v1462_v58 }
 0x17a   :  { %v668_v24 = vpop.f32.mrf.mxu0  ;;  %v836_v20 = vpop.f32.mrf.mxu1 }
 0x17b   :  { %v1421_v1 = vpack.c.bf16 %v668_v24, %v668_v24  ;;  %v1463_v3 = vpack.c.bf16 %v836_v20, %v836_v20 }
 0x17c   :  { %v1607_v14 = vpop.f32.mrf.mxu0  ;;  %v1691_v49 = vpop.f32.mrf.mxu1 }
 0x17d   :  { %1206 = vst.msk [vmem:[%s2766_s2 + $0x98] sm:$0xf] %vm1167_vm1, %v1421_v1  ;;  %1248 = vst.msk [vmem:[%s2766_s2 + $0x140] sm:$0xf] %vm1167_vm1, %v1463_v3 }
 0x17e   :  { %v671_v36 = vpop.f32.mrf.mxu0  ;;  %v839_v34 = vpop.f32.mrf.mxu1 }
 0x17f   :  { %v1422_v35 = vpack.c.bf16 %v671_v36, %v671_v36 }
 0x180   :  { %v1608_v41 = vpop.f32.mrf.mxu0  ;;  %v1692_v44 = vpop.f32.mrf.mxu1 }
 0x181   :  { %1207 = vst.msk [vmem:[%s2766_s2 + $0x9c] sm:$0xf] %vm1167_vm1, %v1422_v35 }
 0x182   :  { %v676_v45 = vpop.f32.mrf.mxu0 }
 0x183   :  { %v1423_v46 = vpack.c.bf16 %v676_v45, %v676_v45 }
 0x184   :  { %v1611_v47 = vpop.f32.mrf.mxu0 }
 0x185   :  { %1208 = vst.msk [vmem:[%s2766_s2 + $0xa0] sm:$0xf] %vm1167_vm1, %v1423_v46 }
 0x186   :  { %v679_v50 = vpop.f32.mrf.mxu0 }
 0x187   :  { %v1424_v51 = vpack.c.bf16 %v679_v50, %v679_v50 }
 0x188   :  { %v1612_v52 = vpop.f32.mrf.mxu0 }
 0x189   :  { %1209 = vst.msk [vmem:[%s2766_s2 + $0xa4] sm:$0xf] %vm1167_vm1, %v1424_v51 }

</bundles_post_ra>
